<compile_context>
chip_gen: v7x
topology: tpu7x:2x2x1
jax: 0.10.0
libtpu: 0.0.40
codegen_flags: <defaults>
</compile_context>

<pallas_src>
import functools

import jax
import jax.numpy as jnp
from jax.experimental import pallas as pl
from jax.experimental.pallas import tpu as pltpu

EPS = 1e-5  # GraphNorm eps


def _round_up(x: int, m: int) -> int:
    return (x + m - 1) // m * m


def _pad2(a, rows, cols, dtype):
    out = jnp.zeros((rows, cols), dtype)
    return out.at[: a.shape[0], : a.shape[1]].set(a.astype(dtype))


def _physical_vmem_bytes() -> int:
    """Per-core VMEM capacity; conservative fallback if the query is unavailable."""
    try:
        info = pltpu.get_tpu_info()
        cap = getattr(info, "vmem_capacity_bytes", None)
        if cap:
            return int(cap)
    except Exception:
        pass
    return 64 << 20  # smallest per-TC VMEM among supported chips (v7x)


def _select_tiling(n_nodes: int, tm, kt, vmem_cap: int):
    """Pick (tm, n_pad, n_tiles, kt, tk).

    tm: row tile (MXU M dim), floored at 128 per review.
    kt: number of K tiles for the adjacency stream; tk = n_pad // kt.
    """
    if tm is None:
        tm = 256
    tm = max(128, min(512, _round_up(tm, 16)))
    n_pad = _round_up(max(n_nodes, tm), tm)
    n_tiles = n_pad // tm

    if kt is None:
        # double-buffered f32 (tm, tk) adjacency block budget (~35% of VMEM)
        budget = max(4 << 20, int(0.35 * vmem_cap))
        kt = n_tiles
        for d in range(1, n_tiles + 1):
            if n_tiles % d:
                continue
            tk = (n_tiles // d) * tm
            if 2 * tm * tk * 4 <= budget:
                kt = d
                break
    if n_tiles % kt:
        raise ValueError(f"kt={kt} must divide n_tiles={n_tiles}")
    tk = (n_tiles // kt) * tm
    return tm, n_pad, n_tiles, kt, tk


def _vmem_limit(n_pad, tm, tk, cin_p, cout_p, cdt_bytes, vmem_cap) -> int:
    resident = (2 * n_pad * cout_p * cdt_bytes   # h1 + h2 (compute dtype)
                + tm * cout_p * 4                # f32 row-tile accumulator
                + 4 * cout_p * 4)                # sum / sumsq / scale / shift
    weights = 2 * ((2 * cin_p + cout_p) * cout_p * cdt_bytes + 4 * cout_p * 4)
    stream = 2 * (tm * tk * 4                    # adj block (f32, double buffered)
                  + tm * cin_p * cdt_bytes       # x1 block
                  + tm * cout_p * 4)             # out block
    need = resident + weights + stream + (4 << 20)
    # Never request more than ~85% of physical VMEM (compiler headroom on v7x,
    # full 128 MiB parts usable on v5e/v6e).
    return int(min(max(need, 16 << 20), int(0.85 * vmem_cap)))


def nin_kernel(x1_ref, adj_ref, w1_ref, b1_ref,
               gnw_ref, gnb_ref, gnms_ref,
               w2h_ref, w2x_ref, b2_ref, out_ref,
               h1_ref, h2_ref, acc_ref, ssum_ref, ssq_ref, scale_ref, shift_ref,
               *, tm, tk, inv_n, compute_dtype):
    p = pl.program_id(0)            # phase: 0=linear1, 1=aggregate+stats, 2=norm+linear2
    t = pl.program_id(1)            # row tile
    k = pl.program_id(2)            # adjacency K tile (phase 1 only)
    n_k = pl.num_programs(2)
    row0 = pl.multiple_of(t * tm, tm)

    # ---- phase 0: h1 tile = ELU(x1 @ W1 + b1), stored resident in bf16 -------
    @pl.when(jnp.logical_and(p == 0, k == 0))
    def _phase_linear1():
        h = jnp.dot(x1_ref[...], w1_ref[...],
                    preferred_element_type=jnp.float32) + b1_ref[...]
        # ELU(alpha=1); exp on min(h, 0) so the inactive branch cannot overflow.
        h = jnp.where(h > 0.0, h, jnp.exp(jnp.minimum(h, 0.0)) - 1.0)
        h1_ref[pl.ds(row0, tm), :] = h.astype(compute_dtype)

    # ---- phase 1: K-tiled adj @ h1 accumulation + streamed GraphNorm sums ----
    @pl.when(p == 1)
    def _phase_aggregate():
        @pl.when(jnp.logical_and(t == 0, k == 0))
        def _init_stats():
            ssum_ref[...] = jnp.zeros_like(ssum_ref)
            ssq_ref[...] = jnp.zeros_like(ssq_ref)

        @pl.when(k == 0)
        def _init_acc():
            acc_ref[...] = jnp.zeros_like(acc_ref)

        col0 = pl.multiple_of(k * tk, tk)
        # adjacency streamed in f32 from HBM; cast the tile to bf16 for the MXU.
        acc_ref[...] += jnp.dot(adj_ref[...].astype(compute_dtype),
                                h1_ref[pl.ds(col0, tk), :],
                                preferred_element_type=jnp.float32)

        @pl.when(k == n_k - 1)
        def _finish_row_tile():
            h2 = acc_ref[...]
            h2_ref[pl.ds(row0, tm), :] = h2.astype(compute_dtype)
            # padded rows of h2 are exactly zero (zero adjacency rows), so
            # summing the whole tile and dividing by the real N is exact.
            ssum_ref[...] += jnp.sum(h2, axis=0, keepdims=True)
            ssq_ref[...] += jnp.sum(h2 * h2, axis=0, keepdims=True)

    # ---- phase 2: finalize stats once, then GraphNorm + linear2 per tile -----
    @pl.when(jnp.logical_and(p == 2, k == 0))
    def _phase_norm_linear2():
        @pl.when(t == 0)
        def _finalize_stats():
            mean = ssum_ref[...] * inv_n
            ms_mean = gnms_ref[...] * mean
            var = ssq_ref[...] * inv_n - 2.0 * ms_mean * mean + ms_mean * ms_mean
            var = jnp.maximum(var, 0.0)
            a = gnw_ref[...] * jax.lax.rsqrt(var + EPS)
            scale_ref[...] = a
            shift_ref[...] = gnb_ref[...] - a * ms_mean

        h2 = h2_ref[pl.ds(row0, tm), :].astype(jnp.float32)
        hn = h2 * scale_ref[...] + shift_ref[...]
        # dropout(p=0.2) is identity in eval mode.
        y = (jnp.dot(hn.astype(compute_dtype), w2h_ref[...],
                     preferred_element_type=jnp.float32)
             + jnp.dot(x1_ref[...], w2x_ref[...],
                       preferred_element_type=jnp.float32)
             + b2_ref[...])
        out_ref[...] = y


def network_in_network(x1, edge_index, edge_weight, params, *,
                       tm=None, kt=None, compute_dtype=jnp.bfloat16):
    """x1: [N, Cin] f32; edge_index: [2, E] i32; edge_weight: [E] f32."""
    N, c_in = x1.shape
    c_out = params["w1"].shape[1]
    cdt_bytes = jnp.dtype(compute_dtype).itemsize
    vmem_cap = _physical_vmem_bytes()

    # lane-dense padding of the feature axes; row/K tiling of the node axis
    cin_p = _round_up(c_in, 128)
    cout_p = _round_up(c_out, 128)
    tm, n_pad, n_tiles, kt, tk = _select_tiling(N, tm, kt, vmem_cap)

    # Glue: materialize the sparse COO adjacency as a dense padded [N_pad, N_pad]
    # f32 matrix (duplicate indices sum, matching torch.sparse_coo_tensor @).
    # Kept in f32 — no standalone bf16 HBM copy; tiles are cast in-kernel.
    adj = jnp.zeros((n_pad, n_pad), jnp.float32).at[
        edge_index[0], edge_index[1]].add(edge_weight.astype(jnp.float32))

    x1p = _pad2(x1, n_pad, cin_p, compute_dtype)
    w1p = _pad2(params["w1"], cin_p, cout_p, compute_dtype)
    b1p = _pad2(params["b1"], 1, cout_p, jnp.float32)
    gnwp = _pad2(params["gn_w"], 1, cout_p, jnp.float32)
    gnbp = _pad2(params["gn_b"], 1, cout_p, jnp.float32)
    gnmsp = _pad2(params["gn_ms"], 1, cout_p, jnp.float32)
    w2hp = _pad2(params["w2h"], cout_p, cout_p, compute_dtype)
    w2xp = _pad2(params["w2x"], cin_p, cout_p, compute_dtype)
    b2p = _pad2(params["b2"], 1, cout_p, jnp.float32)

    param_spec = lambda shape: pl.BlockSpec(shape, lambda p, t, k: (0, 0))
    in_specs = [
        # x1 row tile: only advances in phases 0 and 2 (frozen during phase 1)
        pl.BlockSpec((tm, cin_p), lambda p, t, k: (jnp.where(p == 1, 0, t), 0)),
        # adj (tm, tk) block: only advances during phase 1
        pl.BlockSpec((tm, tk),
                     lambda p, t, k: (jnp.where(p == 1, t, 0),
                                      jnp.where(p == 1, k, 0))),
        param_spec((cin_p, cout_p)),                                           # w1
        param_spec((1, cout_p)),                                               # b1
        param_spec((1, cout_p)),                                               # gn_w
        param_spec((1, cout_p)),                                               # gn_b
        param_spec((1, cout_p)),                                               # gn_ms
        param_spec((cout_p, cout_p)),                                          # w2h
        param_spec((cin_p, cout_p)),                                           # w2x
        param_spec((1, cout_p)),                                               # b2
    ]
    # output blocks only advance (and flush) in phase 2, after they are written
    out_specs = pl.BlockSpec((tm, cout_p),
                             lambda p, t, k: (jnp.where(p == 2, t, 0), 0))

    scratch_shapes = [
        pltpu.VMEM((n_pad, cout_p), compute_dtype),  # h1 (resident, bf16)
        pltpu.VMEM((n_pad, cout_p), compute_dtype),  # h2 (resident, bf16)
        pltpu.VMEM((tm, cout_p), jnp.float32),       # f32 row-tile accumulator
        pltpu.VMEM((1, cout_p), jnp.float32),        # per-feature sum
        pltpu.VMEM((1, cout_p), jnp.float32),        # per-feature sum of squares
        pltpu.VMEM((1, cout_p), jnp.float32),        # GraphNorm scale
        pltpu.VMEM((1, cout_p), jnp.float32),        # GraphNorm shift
    ]

    flops = (2 * n_pad * cin_p * cout_p                 # linear1
             + 2 * n_pad * n_pad * cout_p               # adj @ h
             + 2 * n_pad * (cin_p + cout_p) * cout_p)   # linear2
    bytes_accessed = (n_pad * n_pad * 4                 # f32 adjacency stream
                      + 2 * n_pad * cin_p * cdt_bytes   # x1 (phases 0 and 2)
                      + (2 * cin_p + cout_p) * cout_p * cdt_bytes
                      + n_pad * cout_p * 4)             # output

    out_padded = pl.pallas_call(
        functools.partial(nin_kernel, tm=tm, tk=tk, inv_n=1.0 / float(N),
                          compute_dtype=compute_dtype),
        grid_spec=pltpu.PrefetchScalarGridSpec(
            num_scalar_prefetch=0,
            grid=(3, n_tiles, kt),
            in_specs=in_specs,
            out_specs=out_specs,
            scratch_shapes=scratch_shapes,
        ),
        out_shape=jax.ShapeDtypeStruct((n_pad, cout_p), jnp.float32),
        compiler_params=pltpu.CompilerParams(
            # row/K axes carry resident scratch, the streamed GraphNorm
            # reduction and the K accumulator, so they must remain "arbitrary".
            dimension_semantics=("arbitrary", "arbitrary", "arbitrary"),
            vmem_limit_bytes=_vmem_limit(n_pad, tm, tk, cin_p, cout_p,
                                         cdt_bytes, vmem_cap),
        ),
        cost_estimate=pl.CostEstimate(
            flops=int(flops),
            transcendentals=int(n_pad * cout_p),
            bytes_accessed=int(bytes_accessed),
        ),
    )(x1p, adj, w1p, b1p, gnwp, gnbp, gnmsp, w2hp, w2xp, b2p)

    return out_padded[:N, :c_out]


def network_in_network_ref(x1, edge_index, edge_weight, params,
                           compute_dtype=jnp.bfloat16):
    """Pure-JAX reference using the same bf16-matmul / f32-accumulate recipe."""
    N = x1.shape[0]
    adj = jnp.zeros((N, N), jnp.float32).at[edge_index[0], edge_index[1]].add(
        edge_weight.astype(jnp.float32)).astype(compute_dtype)
    x1c = x1.astype(compute_dtype)
    h = jnp.dot(x1c, params["w1"].astype(compute_dtype),
                preferred_element_type=jnp.float32) + params["b1"]
    h = jnp.where(h > 0.0, h, jnp.exp(jnp.minimum(h, 0.0)) - 1.0)
    h = jnp.dot(adj, h.astype(compute_dtype), preferred_element_type=jnp.float32)
    mean = jnp.mean(h, axis=0, keepdims=True)
    centered = h - params["gn_ms"] * mean
    var = jnp.mean(centered * centered, axis=0, keepdims=True)
    h = params["gn_w"] * centered * jax.lax.rsqrt(var + EPS) + params["gn_b"]
    return (jnp.dot(h.astype(compute_dtype), params["w2h"].astype(compute_dtype),
                    preferred_element_type=jnp.float32)
            + jnp.dot(x1c, params["w2x"].astype(compute_dtype),
                      preferred_element_type=jnp.float32)
            + params["b2"])


def glorot(key, shape):
    fan_in, fan_out = shape
    bound = jnp.sqrt(6.0 / (fan_in + fan_out))
    return jax.random.uniform(key, shape, jnp.float32, -bound, bound)


def init_params(key, c_in, c_out):
    k1, k2 = jax.random.split(key, 2)
    w1 = glorot(k1, (c_in, c_out))                   # linear1: [Cin, Cout]
    w2 = glorot(k2, (c_in + c_out, c_out))           # linear2: [Cin+Cout, Cout]
    return {
        "w1": w1,
        "b1": jnp.zeros((1, c_out), jnp.float32),
        # GraphNorm reset_parameters(): weight=1, bias=0, mean_scale=1
        "gn_w": jnp.ones((1, c_out), jnp.float32),
        "gn_b": jnp.zeros((1, c_out), jnp.float32),
        "gn_ms": jnp.ones((1, c_out), jnp.float32),
        # split W2 to implement concat([h, x1]) @ W2 as two matmuls
        "w2h": w2[:c_out, :],                        # multiplies h   [Cout, Cout]
        "w2x": w2[c_out:, :],                        # multiplies x1  [Cin,  Cout]
        "b2": jnp.zeros((1, c_out), jnp.float32),
    }


if __name__ == "__main__":
    N, C_IN, C_OUT, E = 384, 8, 16, 1536

    key = jax.random.PRNGKey(0)
    kx, ks, kd, kw, kp = jax.random.split(key, 5)

    x1 = jax.random.normal(kx, (N, C_IN), jnp.float32)
    src = jax.random.randint(ks, (E,), 0, N, jnp.int32)
    dst = jax.random.randint(kd, (E,), 0, N, jnp.int32)
    edge_index = jnp.stack([src, dst], axis=0)                 # [2, E]
    edge_weight = jax.random.uniform(kw, (E,), jnp.float32)    # [E]

    params = init_params(kp, C_IN, C_OUT)
    ref = network_in_network_ref(x1, edge_index, edge_weight, params)

    fn = jax.jit(network_in_network, static_argnames=("tm", "kt", "compute_dtype"))

    # Config 1: auto tiling (single K tile, default tm).
    out = fn(x1, edge_index, edge_weight, params)
    jax.block_until_ready(out)
    assert out.shape == (N, C_OUT) and out.dtype == jnp.float32
    assert bool(jnp.allclose(out, ref, atol=3e-2, rtol=3e-2)), (
        "auto tiling max abs err = %f" % float(jnp.max(jnp.abs(out - ref))))

    # Config 2: tm=128, kt=3 -> 3 row tiles x 3 K tiles, exercising the streamed
    # GraphNorm reduction and the K-tiled adjacency accumulation path.
    out2 = fn(x1, edge_index, edge_weight, params, tm=128, kt=3)
    jax.block_until_ready(out2)
    assert bool(jnp.allclose(out2, ref, atol=3e-2, rtol=3e-2)), (
        "tiled path max abs err = %f" % float(jnp.max(jnp.abs(out2 - ref))))

    print("KERNEL_OK")
</pallas_src>

<mosaic_0001>
module attributes {stable_mosaic.version = 11 : i64} {
  func.func private @main(%arg0: i32) attributes {dimension_semantics = [#tpu.dimension_semantics<core_parallel>], iteration_bounds = array<i64: 2>, tpu.core_type = #tpu.core_type<sc_scalar_subcore>, window_params = []} {
    return
  }
}

module attributes {stable_mosaic.version = 11 : i64} {
  func.func private @main(%arg0: i32) attributes {dimension_semantics = [#tpu.dimension_semantics<core_parallel>], iteration_bounds = array<i64: 2>, tpu.core_type = #tpu.core_type<sc_scalar_subcore>, window_params = []} {
    return
  }
}

module attributes {stable_mosaic.version = 11 : i64} {
  func.func @nin_kernel(%arg0: i32, %arg1: i32, %arg2: i32, %arg3: memref<256x128xbf16, #tpu.memory_space<vmem>>, %arg4: memref<256x512xf32, #tpu.memory_space<vmem>>, %arg5: memref<128x128xbf16, #tpu.memory_space<vmem>>, %arg6: memref<1x128xf32, #tpu.memory_space<vmem>>, %arg7: memref<1x128xf32, #tpu.memory_space<vmem>>, %arg8: memref<1x128xf32, #tpu.memory_space<vmem>>, %arg9: memref<1x128xf32, #tpu.memory_space<vmem>>, %arg10: memref<128x128xbf16, #tpu.memory_space<vmem>>, %arg11: memref<128x128xbf16, #tpu.memory_space<vmem>>, %arg12: memref<1x128xf32, #tpu.memory_space<vmem>>, %arg13: memref<256x128xf32, #tpu.memory_space<vmem>>, %arg14: memref<512x128xbf16, #tpu.memory_space<vmem>>, %arg15: memref<512x128xbf16, #tpu.memory_space<vmem>>, %arg16: memref<256x128xf32, #tpu.memory_space<vmem>>, %arg17: memref<1x128xf32, #tpu.memory_space<vmem>>, %arg18: memref<1x128xf32, #tpu.memory_space<vmem>>, %arg19: memref<1x128xf32, #tpu.memory_space<vmem>>, %arg20: memref<1x128xf32, #tpu.memory_space<vmem>>) attributes {dimension_semantics = [#tpu.dimension_semantics<arbitrary>, #tpu.dimension_semantics<arbitrary>, #tpu.dimension_semantics<arbitrary>], iteration_bounds = array<i64: 3, 2, 1>, scalar_prefetch = 0 : i64, scratch_operands = 7 : i64, tpu.core_type = #tpu.core_type<tc>, window_params = [{transform_indices = @transform_0, window_bounds = array<i64: 256, 128>}, {transform_indices = @transform_1, window_bounds = array<i64: 256, 512>}, {pipeline_mode = #tpu.pipeline_mode<synchronous>, transform_indices = @transform_2, window_bounds = array<i64: 128, 128>}, {pipeline_mode = #tpu.pipeline_mode<synchronous>, transform_indices = @transform_3, window_bounds = array<i64: 1, 128>}, {pipeline_mode = #tpu.pipeline_mode<synchronous>, transform_indices = @transform_4, window_bounds = array<i64: 1, 128>}, {pipeline_mode = #tpu.pipeline_mode<synchronous>, transform_indices = @transform_5, window_bounds = array<i64: 1, 128>}, {pipeline_mode = #tpu.pipeline_mode<synchronous>, transform_indices = @transform_6, window_bounds = array<i64: 1, 128>}, {pipeline_mode = #tpu.pipeline_mode<synchronous>, transform_indices = @transform_7, window_bounds = array<i64: 128, 128>}, {pipeline_mode = #tpu.pipeline_mode<synchronous>, transform_indices = @transform_8, window_bounds = array<i64: 128, 128>}, {pipeline_mode = #tpu.pipeline_mode<synchronous>, transform_indices = @transform_9, window_bounds = array<i64: 1, 128>}, {transform_indices = @transform_10, window_bounds = array<i64: 256, 128>}]} {
    %c256_i32 = arith.constant 256 : i32
    %0 = arith.muli %arg1, %c256_i32 : i32
    %1 = tpu.assume_multiple %0, 256 : i32
    %c0_i32 = arith.constant 0 : i32
    %2 = arith.cmpi eq, %arg0, %c0_i32 : i32
    %c0_i32_0 = arith.constant 0 : i32
    %3 = arith.cmpi eq, %arg2, %c0_i32_0 : i32
    %4 = arith.andi %2, %3 : i1
    %5 = arith.extui %4 : i1 to i32
    %c0_i32_1 = arith.constant 0 : i32
    %6 = arith.cmpi ne, %5, %c0_i32_1 : i32
    scf.if %6 {
      %c0 = arith.constant 0 : index
      %c0_5 = arith.constant 0 : index
      %15 = vector.load %arg3[%c0, %c0_5] : memref<256x128xbf16, #tpu.memory_space<vmem>>, vector<256x128xbf16>
      %c0_6 = arith.constant 0 : index
      %c0_7 = arith.constant 0 : index
      %16 = vector.load %arg5[%c0_6, %c0_7] : memref<128x128xbf16, #tpu.memory_space<vmem>>, vector<128x128xbf16>
      %cst = arith.constant dense<0.000000e+00> : vector<256x128xf32>
      %17 = tpu.matmul %15, %16, %cst {dimension_numbers = #tpu.dot_dimension_numbers<[1], [0], [0], [1], [0, 0, 1, 1], [], []>} : vector<256x128xbf16>, vector<128x128xbf16>, vector<256x128xf32> -> vector<256x128xf32>
      %c0_8 = arith.constant 0 : index
      %c0_9 = arith.constant 0 : index
      %18 = vector.load %arg6[%c0_8, %c0_9] : memref<1x128xf32, #tpu.memory_space<vmem>>, vector<1x128xf32>
      %19 = vector.broadcast %18 : vector<1x128xf32> to vector<256x128xf32>
      %20 = arith.addf %17, %19 : vector<256x128xf32>
      %cst_10 = arith.constant 0.000000e+00 : f32
      %21 = vector.broadcast %cst_10 : f32 to vector<256x128xf32>
      %22 = arith.cmpf ogt, %20, %21 : vector<256x128xf32>
      %cst_11 = arith.constant 0.000000e+00 : f32
      %23 = vector.broadcast %cst_11 : f32 to vector<256x128xf32>
      %24 = arith.minimumf %20, %23 : vector<256x128xf32>
      %25 = math.exp %24 : vector<256x128xf32>
      %cst_12 = arith.constant 1.000000e+00 : f32
      %26 = vector.broadcast %cst_12 : f32 to vector<256x128xf32>
      %27 = arith.subf %25, %26 : vector<256x128xf32>
      %28 = arith.select %22, %20, %27 : vector<256x128xi1>, vector<256x128xf32>
      %29 = arith.truncf %28 : vector<256x128xf32> to vector<256x128xbf16>
      %30 = arith.index_cast %1 : i32 to index
      %c0_13 = arith.constant 0 : index
      %31 = vector.load %arg14[%30, %c0_13] : memref<512x128xbf16, #tpu.memory_space<vmem>>, vector<256x128xbf16>
      tpu.vector_store %arg14[%30, %c0_13], %29 {strides = array<i32>} : memref<512x128xbf16, #tpu.memory_space<vmem>>, vector<256x128xbf16>,
    } else {
    }
    %c1_i32 = arith.constant 1 : i32
    %7 = arith.cmpi eq, %arg0, %c1_i32 : i32
    %8 = arith.extui %7 : i1 to i32
    %c0_i32_2 = arith.constant 0 : i32
    %9 = arith.cmpi ne, %8, %c0_i32_2 : i32
    scf.if %9 {
      %c0_i32_5 = arith.constant 0 : i32
      %15 = arith.cmpi eq, %arg1, %c0_i32_5 : i32
      %c0_i32_6 = arith.constant 0 : i32
      %16 = arith.cmpi eq, %arg2, %c0_i32_6 : i32
      %17 = arith.andi %15, %16 : i1
      %18 = arith.extui %17 : i1 to i32
      %c0_i32_7 = arith.constant 0 : i32
      %19 = arith.cmpi ne, %18, %c0_i32_7 : i32
      scf.if %19 {
        %cst_18 = arith.constant 0.000000e+00 : f32
        %36 = vector.broadcast %cst_18 : f32 to vector<1x128xf32>
        %c0_19 = arith.constant 0 : index
        %c0_20 = arith.constant 0 : index
        %37 = vector.load %arg17[%c0_19, %c0_20] : memref<1x128xf32, #tpu.memory_space<vmem>>, vector<1x128xf32>
        tpu.vector_store %arg17[%c0_19, %c0_20], %36 {strides = array<i32>} : memref<1x128xf32, #tpu.memory_space<vmem>>, vector<1x128xf32>,
        %cst_21 = arith.constant 0.000000e+00 : f32
        %38 = vector.broadcast %cst_21 : f32 to vector<1x128xf32>
        %c0_22 = arith.constant 0 : index
        %c0_23 = arith.constant 0 : index
        %39 = vector.load %arg18[%c0_22, %c0_23] : memref<1x128xf32, #tpu.memory_space<vmem>>, vector<1x128xf32>
        tpu.vector_store %arg18[%c0_22, %c0_23], %38 {strides = array<i32>} : memref<1x128xf32, #tpu.memory_space<vmem>>, vector<1x128xf32>,
      } else {
      }
      %c0_i32_8 = arith.constant 0 : i32
      %20 = arith.cmpi eq, %arg2, %c0_i32_8 : i32
      %21 = arith.extui %20 : i1 to i32
      %c0_i32_9 = arith.constant 0 : i32
      %22 = arith.cmpi ne, %21, %c0_i32_9 : i32
      scf.if %22 {
        %cst_18 = arith.constant 0.000000e+00 : f32
        %36 = vector.broadcast %cst_18 : f32 to vector<256x128xf32>
        %c0_19 = arith.constant 0 : index
        %c0_20 = arith.constant 0 : index
        %37 = vector.load %arg16[%c0_19, %c0_20] : memref<256x128xf32, #tpu.memory_space<vmem>>, vector<256x128xf32>
        tpu.vector_store %arg16[%c0_19, %c0_20], %36 {strides = array<i32>} : memref<256x128xf32, #tpu.memory_space<vmem>>, vector<256x128xf32>,
      } else {
      }
      %c512_i32 = arith.constant 512 : i32
      %23 = arith.muli %arg2, %c512_i32 : i32
      %24 = tpu.assume_multiple %23, 512 : i32
      %c0 = arith.constant 0 : index
      %c0_10 = arith.constant 0 : index
      %25 = vector.load %arg16[%c0, %c0_10] : memref<256x128xf32, #tpu.memory_space<vmem>>, vector<256x128xf32>
      %c0_11 = arith.constant 0 : index
      %c0_12 = arith.constant 0 : index
      %26 = vector.load %arg4[%c0_11, %c0_12] : memref<256x512xf32, #tpu.memory_space<vmem>>, vector<256x512xf32>
      %27 = arith.truncf %26 : vector<256x512xf32> to vector<256x512xbf16>
      %28 = arith.index_cast %24 : i32 to index
      %c0_13 = arith.constant 0 : index
      %29 = vector.load %arg14[%28, %c0_13] : memref<512x128xbf16, #tpu.memory_space<vmem>>, vector<512x128xbf16>
      %cst = arith.constant dense<0.000000e+00> : vector<256x128xf32>
      %30 = tpu.matmul %27, %29, %cst {dimension_numbers = #tpu.dot_dimension_numbers<[1], [0], [0], [1], [0, 0, 1, 1], [], []>} : vector<256x512xbf16>, vector<512x128xbf16>, vector<256x128xf32> -> vector<256x128xf32>
      %31 = arith.addf %25, %30 : vector<256x128xf32>
      %c0_14 = arith.constant 0 : index
      %c0_15 = arith.constant 0 : index
      %32 = vector.load %arg16[%c0_14, %c0_15] : memref<256x128xf32, #tpu.memory_space<vmem>>, vector<256x128xf32>
      tpu.vector_store %arg16[%c0_14, %c0_15], %31 {strides = array<i32>} : memref<256x128xf32, #tpu.memory_space<vmem>>, vector<256x128xf32>,
      %c0_i32_16 = arith.constant 0 : i32
      %33 = arith.cmpi eq, %arg2, %c0_i32_16 : i32
      %34 = arith.extui %33 : i1 to i32
      %c0_i32_17 = arith.constant 0 : i32
      %35 = arith.cmpi ne, %34, %c0_i32_17 : i32
      scf.if %35 {
        %c0_18 = arith.constant 0 : index
        %c0_19 = arith.constant 0 : index
        %36 = vector.load %arg16[%c0_18, %c0_19] : memref<256x128xf32, #tpu.memory_space<vmem>>, vector<256x128xf32>
        %37 = arith.truncf %36 : vector<256x128xf32> to vector<256x128xbf16>
        %38 = arith.index_cast %1 : i32 to index
        %c0_20 = arith.constant 0 : index
        %39 = vector.load %arg15[%38, %c0_20] : memref<512x128xbf16, #tpu.memory_space<vmem>>, vector<256x128xbf16>
        tpu.vector_store %arg15[%38, %c0_20], %37 {strides = array<i32>} : memref<512x128xbf16, #tpu.memory_space<vmem>>, vector<256x128xbf16>,
        %c0_21 = arith.constant 0 : index
        %c0_22 = arith.constant 0 : index
        %40 = vector.load %arg17[%c0_21, %c0_22] : memref<1x128xf32, #tpu.memory_space<vmem>>, vector<1x128xf32>
        %cst_23 = arith.constant dense<0.000000e+00> : vector<128xf32>
        %41 = vector.multi_reduction <add>, %36, %cst_23 [0] : vector<256x128xf32> to vector<128xf32>
        %42 = vector.shape_cast %41 : vector<128xf32> to vector<1x128xf32>
        %43 = arith.addf %40, %42 : vector<1x128xf32>
        %c0_24 = arith.constant 0 : index
        %c0_25 = arith.constant 0 : index
        %44 = vector.load %arg17[%c0_24, %c0_25] : memref<1x128xf32, #tpu.memory_space<vmem>>, vector<1x128xf32>
        tpu.vector_store %arg17[%c0_24, %c0_25], %43 {strides = array<i32>} : memref<1x128xf32, #tpu.memory_space<vmem>>, vector<1x128xf32>,
        %c0_26 = arith.constant 0 : index
        %c0_27 = arith.constant 0 : index
        %45 = vector.load %arg18[%c0_26, %c0_27] : memref<1x128xf32, #tpu.memory_space<vmem>>, vector<1x128xf32>
        %46 = arith.mulf %36, %36 : vector<256x128xf32>
        %cst_28 = arith.constant dense<0.000000e+00> : vector<128xf32>
        %47 = vector.multi_reduction <add>, %46, %cst_28 [0] : vector<256x128xf32> to vector<128xf32>
        %48 = vector.shape_cast %47 : vector<128xf32> to vector<1x128xf32>
        %49 = arith.addf %45, %48 : vector<1x128xf32>
        %c0_29 = arith.constant 0 : index
        %c0_30 = arith.constant 0 : index
        %50 = vector.load %arg18[%c0_29, %c0_30] : memref<1x128xf32, #tpu.memory_space<vmem>>, vector<1x128xf32>
        tpu.vector_store %arg18[%c0_29, %c0_30], %49 {strides = array<i32>} : memref<1x128xf32, #tpu.memory_space<vmem>>, vector<1x128xf32>,
      } else {
      }
    } else {
    }
    %c2_i32 = arith.constant 2 : i32
    %10 = arith.cmpi eq, %arg0, %c2_i32 : i32
    %c0_i32_3 = arith.constant 0 : i32
    %11 = arith.cmpi eq, %arg2, %c0_i32_3 : i32
    %12 = arith.andi %10, %11 : i1
    %13 = arith.extui %12 : i1 to i32
    %c0_i32_4 = arith.constant 0 : i32
    %14 = arith.cmpi ne, %13, %c0_i32_4 : i32
    scf.if %14 {
      %c0_i32_5 = arith.constant 0 : i32
      %15 = arith.cmpi eq, %arg1, %c0_i32_5 : i32
      %16 = arith.extui %15 : i1 to i32
      %c0_i32_6 = arith.constant 0 : i32
      %17 = arith.cmpi ne, %16, %c0_i32_6 : i32
      scf.if %17 {
        %c0_22 = arith.constant 0 : index
        %c0_23 = arith.constant 0 : index
        %38 = vector.load %arg17[%c0_22, %c0_23] : memref<1x128xf32, #tpu.memory_space<vmem>>, vector<1x128xf32>
        %cst_24 = arith.constant 0.00260416674 : f32
        %39 = vector.broadcast %cst_24 : f32 to vector<1x128xf32>
        %40 = arith.mulf %38, %39 : vector<1x128xf32>
        %c0_25 = arith.constant 0 : index
        %c0_26 = arith.constant 0 : index
        %41 = vector.load %arg9[%c0_25, %c0_26] : memref<1x128xf32, #tpu.memory_space<vmem>>, vector<1x128xf32>
        %42 = arith.mulf %41, %40 : vector<1x128xf32>
        %c0_27 = arith.constant 0 : index
        %c0_28 = arith.constant 0 : index
        %43 = vector.load %arg18[%c0_27, %c0_28] : memref<1x128xf32, #tpu.memory_space<vmem>>, vector<1x128xf32>
        %cst_29 = arith.constant 0.00260416674 : f32
        %44 = vector.broadcast %cst_29 : f32 to vector<1x128xf32>
        %45 = arith.mulf %43, %44 : vector<1x128xf32>
        %cst_30 = arith.constant 2.000000e+00 : f32
        %46 = vector.broadcast %cst_30 : f32 to vector<1x128xf32>
        %47 = arith.mulf %46, %42 : vector<1x128xf32>
        %48 = arith.mulf %47, %40 : vector<1x128xf32>
        %49 = arith.subf %45, %48 : vector<1x128xf32>
        %50 = arith.mulf %42, %42 : vector<1x128xf32>
        %51 = arith.addf %49, %50 : vector<1x128xf32>
        %cst_31 = arith.constant 0.000000e+00 : f32
        %52 = vector.broadcast %cst_31 : f32 to vector<1x128xf32>
        %53 = arith.maximumf %51, %52 : vector<1x128xf32>
        %c0_32 = arith.constant 0 : index
        %c0_33 = arith.constant 0 : index
        %54 = vector.load %arg7[%c0_32, %c0_33] : memref<1x128xf32, #tpu.memory_space<vmem>>, vector<1x128xf32>
        %cst_34 = arith.constant 9.99999974E-6 : f32
        %55 = vector.broadcast %cst_34 : f32 to vector<1x128xf32>
        %56 = arith.addf %53, %55 : vector<1x128xf32>
        %57 = math.rsqrt %56 : vector<1x128xf32>
        %58 = arith.mulf %54, %57 : vector<1x128xf32>
        %c0_35 = arith.constant 0 : index
        %c0_36 = arith.constant 0 : index
        %59 = vector.load %arg19[%c0_35, %c0_36] : memref<1x128xf32, #tpu.memory_space<vmem>>, vector<1x128xf32>
        tpu.vector_store %arg19[%c0_35, %c0_36], %58 {strides = array<i32>} : memref<1x128xf32, #tpu.memory_space<vmem>>, vector<1x128xf32>,
        %c0_37 = arith.constant 0 : index
        %c0_38 = arith.constant 0 : index
        %60 = vector.load %arg8[%c0_37, %c0_38] : memref<1x128xf32, #tpu.memory_space<vmem>>, vector<1x128xf32>
        %61 = arith.mulf %58, %42 : vector<1x128xf32>
        %62 = arith.subf %60, %61 : vector<1x128xf32>
        %c0_39 = arith.constant 0 : index
        %c0_40 = arith.constant 0 : index
        %63 = vector.load %arg20[%c0_39, %c0_40] : memref<1x128xf32, #tpu.memory_space<vmem>>, vector<1x128xf32>
        tpu.vector_store %arg20[%c0_39, %c0_40], %62 {strides = array<i32>} : memref<1x128xf32, #tpu.memory_space<vmem>>, vector<1x128xf32>,
      } else {
      }
      %18 = arith.index_cast %1 : i32 to index
      %c0 = arith.constant 0 : index
      %19 = vector.load %arg15[%18, %c0] : memref<512x128xbf16, #tpu.memory_space<vmem>>, vector<256x128xbf16>
      %20 = arith.extf %19 : vector<256x128xbf16> to vector<256x128xf32>
      %c0_7 = arith.constant 0 : index
      %c0_8 = arith.constant 0 : index
      %21 = vector.load %arg19[%c0_7, %c0_8] : memref<1x128xf32, #tpu.memory_space<vmem>>, vector<1x128xf32>
      %22 = vector.broadcast %21 : vector<1x128xf32> to vector<256x128xf32>
      %23 = arith.mulf %20, %22 : vector<256x128xf32>
      %c0_9 = arith.constant 0 : index
      %c0_10 = arith.constant 0 : index
      %24 = vector.load %arg20[%c0_9, %c0_10] : memref<1x128xf32, #tpu.memory_space<vmem>>, vector<1x128xf32>
      %25 = vector.broadcast %24 : vector<1x128xf32> to vector<256x128xf32>
      %26 = arith.addf %23, %25 : vector<256x128xf32>
      %27 = arith.truncf %26 : vector<256x128xf32> to vector<256x128xbf16>
      %c0_11 = arith.constant 0 : index
      %c0_12 = arith.constant 0 : index
      %28 = vector.load %arg10[%c0_11, %c0_12] : memref<128x128xbf16, #tpu.memory_space<vmem>>, vector<128x128xbf16>
      %cst = arith.constant dense<0.000000e+00> : vector<256x128xf32>
      %29 = tpu.matmul %27, %28, %cst {dimension_numbers = #tpu.dot_dimension_numbers<[1], [0], [0], [1], [0, 0, 1, 1], [], []>} : vector<256x128xbf16>, vector<128x128xbf16>, vector<256x128xf32> -> vector<256x128xf32>
      %c0_13 = arith.constant 0 : index
      %c0_14 = arith.constant 0 : index
      %30 = vector.load %arg3[%c0_13, %c0_14] : memref<256x128xbf16, #tpu.memory_space<vmem>>, vector<256x128xbf16>
      %c0_15 = arith.constant 0 : index
      %c0_16 = arith.constant 0 : index
      %31 = vector.load %arg11[%c0_15, %c0_16] : memref<128x128xbf16, #tpu.memory_space<vmem>>, vector<128x128xbf16>
      %cst_17 = arith.constant dense<0.000000e+00> : vector<256x128xf32>
      %32 = tpu.matmul %30, %31, %cst_17 {dimension_numbers = #tpu.dot_dimension_numbers<[1], [0], [0], [1], [0, 0, 1, 1], [], []>} : vector<256x128xbf16>, vector<128x128xbf16>, vector<256x128xf32> -> vector<256x128xf32>
      %33 = arith.addf %29, %32 : vector<256x128xf32>
      %c0_18 = arith.constant 0 : index
      %c0_19 = arith.constant 0 : index
      %34 = vector.load %arg12[%c0_18, %c0_19] : memref<1x128xf32, #tpu.memory_space<vmem>>, vector<1x128xf32>
      %35 = vector.broadcast %34 : vector<1x128xf32> to vector<256x128xf32>
      %36 = arith.addf %33, %35 : vector<256x128xf32>
      %c0_20 = arith.constant 0 : index
      %c0_21 = arith.constant 0 : index
      %37 = vector.load %arg13[%c0_20, %c0_21] : memref<256x128xf32, #tpu.memory_space<vmem>>, vector<256x128xf32>
      tpu.vector_store %arg13[%c0_20, %c0_21], %36 {strides = array<i32>} : memref<256x128xf32, #tpu.memory_space<vmem>>, vector<256x128xf32>,
    } else {
    }
    return
  }
  func.func @transform_0(%arg0: i32, %arg1: i32, %arg2: i32) -> (i32, i32) {
    %c1_i32 = arith.constant 1 : i32
    %0 = arith.cmpi eq, %arg0, %c1_i32 : i32
    %c0_i32 = arith.constant 0 : i32
    %1 = arith.select %0, %c0_i32, %arg1 : i32
    %c0_i32_0 = arith.constant 0 : i32
    %c0_i32_1 = arith.constant 0 : i32
    return %1, %c0_i32_0 : i32, i32
  }
  func.func @transform_1(%arg0: i32, %arg1: i32, %arg2: i32) -> (i32, i32) {
    %c1_i32 = arith.constant 1 : i32
    %0 = arith.cmpi eq, %arg0, %c1_i32 : i32
    %c0_i32 = arith.constant 0 : i32
    %1 = arith.select %0, %arg1, %c0_i32 : i32
    %c1_i32_0 = arith.constant 1 : i32
    %2 = arith.cmpi eq, %arg0, %c1_i32_0 : i32
    %c0_i32_1 = arith.constant 0 : i32
    %3 = arith.select %2, %arg2, %c0_i32_1 : i32
    %c0_i32_2 = arith.constant 0 : i32
    return %1, %3 : i32, i32
  }
  func.func @transform_2(%arg0: i32, %arg1: i32, %arg2: i32) -> (i32, i32) {
    %c0_i32 = arith.constant 0 : i32
    %c0_i32_0 = arith.constant 0 : i32
    %c0_i32_1 = arith.constant 0 : i32
    return %c0_i32, %c0_i32_0 : i32, i32
  }
  func.func @transform_3(%arg0: i32, %arg1: i32, %arg2: i32) -> (i32, i32) {
    %c0_i32 = arith.constant 0 : i32
    %c0_i32_0 = arith.constant 0 : i32
    %c0_i32_1 = arith.constant 0 : i32
    return %c0_i32, %c0_i32_0 : i32, i32
  }
  func.func @transform_4(%arg0: i32, %arg1: i32, %arg2: i32) -> (i32, i32) {
    %c0_i32 = arith.constant 0 : i32
    %c0_i32_0 = arith.constant 0 : i32
    %c0_i32_1 = arith.constant 0 : i32
    return %c0_i32, %c0_i32_0 : i32, i32
  }
  func.func @transform_5(%arg0: i32, %arg1: i32, %arg2: i32) -> (i32, i32) {
    %c0_i32 = arith.constant 0 : i32
    %c0_i32_0 = arith.constant 0 : i32
    %c0_i32_1 = arith.constant 0 : i32
    return %c0_i32, %c0_i32_0 : i32, i32
  }
  func.func @transform_6(%arg0: i32, %arg1: i32, %arg2: i32) -> (i32, i32) {
    %c0_i32 = arith.constant 0 : i32
    %c0_i32_0 = arith.constant 0 : i32
    %c0_i32_1 = arith.constant 0 : i32
    return %c0_i32, %c0_i32_0 : i32, i32
  }
  func.func @transform_7(%arg0: i32, %arg1: i32, %arg2: i32) -> (i32, i32) {
    %c0_i32 = arith.constant 0 : i32
    %c0_i32_0 = arith.constant 0 : i32
    %c0_i32_1 = arith.constant 0 : i32
    return %c0_i32, %c0_i32_0 : i32, i32
  }
  func.func @transform_8(%arg0: i32, %arg1: i32, %arg2: i32) -> (i32, i32) {
    %c0_i32 = arith.constant 0 : i32
    %c0_i32_0 = arith.constant 0 : i32
    %c0_i32_1 = arith.constant 0 : i32
    return %c0_i32, %c0_i32_0 : i32, i32
  }
  func.func @transform_9(%arg0: i32, %arg1: i32, %arg2: i32) -> (i32, i32) {
    %c0_i32 = arith.constant 0 : i32
    %c0_i32_0 = arith.constant 0 : i32
    %c0_i32_1 = arith.constant 0 : i32
    return %c0_i32, %c0_i32_0 : i32, i32
  }
  func.func @transform_10(%arg0: i32, %arg1: i32, %arg2: i32) -> (i32, i32) {
    %c2_i32 = arith.constant 2 : i32
    %0 = arith.cmpi eq, %arg0, %c2_i32 : i32
    %c0_i32 = arith.constant 0 : i32
    %1 = arith.select %0, %arg1, %c0_i32 : i32
    %c0_i32_0 = arith.constant 0 : i32
    %c0_i32_1 = arith.constant 0 : i32
    return %1, %c0_i32_0 : i32, i32
  }
}

</mosaic_0001>

<bundles_post_ra>
// kernel: network_in_network.1
= control target key start
LH: loop header
LB: loop body
LE: loop exit
PB: predicated region body
PF: predicated region fallthrough
CT: control target
= control target key end

     0   :  { %s3734_s13 = smov 0   ;;  %s3736_s14 = smov 0   ;;  %s4544_s0 = inlined_call_operand.vmem [shape: bf16[512,128], index: 0, kind: input, shape index: {}]   ;;  %s4545_s1 = inlined_call_operand.vmem [shape: f32[512,512], index: 1, kind: input, shape index: {}]   ;;  %s4546_s2 = inlined_call_operand.vmem [shape: bf16[128,128], index: 2, kind: input, shape index: {}]   ;;  %s4547_s3 = inlined_call_operand.vmem [shape: f32[1,128], index: 3, kind: input, shape index: {}]   ;;  %s4548_s4 = inlined_call_operand.vmem [shape: f32[1,128], index: 4, kind: input, shape index: {}]   ;;  %s4549_s5 = inlined_call_operand.vmem [shape: f32[1,128], index: 5, kind: input, shape index: {}]   ;;  %s4550_s6 = inlined_call_operand.vmem [shape: f32[1,128], index: 6, kind: input, shape index: {}]   ;;  %s4551_s7 = inlined_call_operand.vmem [shape: bf16[128,128], index: 7, kind: input, shape index: {}]   ;;  %s4552_s8 = inlined_call_operand.vmem [shape: bf16[128,128], index: 8, kind: input, shape index: {}]   ;;  %s4553_s9 = inlined_call_operand.vmem [shape: f32[1,128], index: 9, kind: input, shape index: {}]   ;;  %s4554_s10 = inlined_call_operand.vmem [shape: f32[512,128], index: 10, kind: output, shape index: {}]  }
   0x1   :  { %s3738_s15 = smov 0   ;;  %s3740_s16 = smov 0  }
   0x2   :  { %s3742_s17 = smov 0  }
   0x3 LB: > { %4556 = sst [smem:[#allocation9_spill]] %s3672_s16  ;;  %s35_s18 = sadd.s32 1, %s3668_s15  ;;  %s3676_s17 = sphi %s3742_s17, %s20_s17   ;;  %s3672_s16 = sphi %s3740_s16, %s4561_s16   ;;  %s3668_s15 = sphi %s3738_s15, %s4563_s15   ;;  %s3664_s14 = sphi %s3736_s14, %s4559_s14   ;;  %s3660_s13 = sphi %s3734_s13, %s4562_s13  }
   0x4   : > { %s39_s19 = sadd.s32 1, %s3672_s16  ;;  %p37_p0 = scmp.ge.s32.totalorder %s35_s18, 2 }
   0x5   : > { %p2872_p1 = scmp.ge.s32.totalorder %s3676_s17, 1  ;;  %p375_p2 = scmp.lt.s32.totalorder %s3676_s17, 7 }
   0x6   : > { %s4565_s18 = smov (%p37_p0, %s35_s18), 0  ;;  %s4567_s19 = smov (!%p37_p0, %s39_s19), %s3672_s16 }
   0x7   : > { %4557 = sst [smem:[#allocation10_spill]] %s4565_s18  ;;  %p376_p3 = pnand %p2872_p1, %p375_p2 }
   0x8   : > { %p41_p4 = scmp.ge.s32.totalorder %s4567_s19, 3  ;;  %p430_p5 = scmp.eq.s32.totalorder (!%p376_p3), %s3664_s14, 1 }
   0x9   : > { %379 = sbr.rel (%p376_p3) target bundleno = 1094 (0x446), region = 60  ;;  %s3770_s20 = sshll.u32 (!%p376_p3), %s3660_s13, 8 }
   0xa   : > { %s4569_s19 = smov (%p41_p4, %s4567_s19), 0  ;;  %p470_p6 = scmp.eq.s32.totalorder (!%p376_p3), %s3664_s14, 0 }
   0xb   : > { %4558 = sst [smem:[#allocation11_spill]] %s4569_s19  ;;  %p458_p9 = scmp.eq.s32.totalorder (!%p376_p3), %s3664_s14, 2 }
  0x10   : > { %s431_s21 = scalar_select %p430_p5, 0, %s3660_s13 }
  0x11   : > { %s441_s22 = scalar_select %p430_p5, %s3660_s13, 0 }
  0x12   : > { %s2873_s23 = sshll.u32 %s431_s21, 5  ;;  %v3516_v0 = vld [vmem:[%s4546_s2] sm:$0xff] (%p470_p6)   ;;  %v3517_v1 = vld [vmem:[%s4546_s2 + $0x8] sm:$0xff] (%p470_p6)   ;;  %v3518_v2 = vld [vmem:[%s4546_s2 + $0x10] sm:$0xff] (%p470_p6)  }
  0x13   : > { %p433_p7 = scmp.lt.s32.totalorder %s2873_s23, 63  ;;  %s2875_s24 = sshll.u32 %s441_s22, 5  ;;  %3283 = vmatprep.subr.bf16.mxu0 (%p470_p6), %v3516_v0  ;;  %3427 = vmatprep.subr.bf16.mxu1 (%p470_p6), %v3516_v0  ;;  %v3519_v3 = vld [vmem:[%s4546_s2 + $0x18] sm:$0xff] (%p470_p6)   ;;  %v3520_v6 = vld [vmem:[%s4546_s2 + $0x20] sm:$0xff] (%p470_p6)   ;;  %v3521_v7 = vld [vmem:[%s4546_s2 + $0x28] sm:$0xff] (%p470_p6)  }
  0x14   : > { %p445_p8 = scmp.lt.s32.totalorder %s2875_s24, 63  ;;  %3284 = vmatpush3.bf16.msra.mxu0 (%p470_p6), %v3516_v0  ;;  %3435 = vmatpush3.bf16.msra.mxu1 (%p470_p6), %v3516_v0  ;;  %v3522_v8 = vld [vmem:[%s4546_s2 + $0x30] sm:$0xff] (%p470_p6)   ;;  %v3523_v9 = vld [vmem:[%s4546_s2 + $0x38] sm:$0xff] (%p470_p6)   ;;  %v3839_v24 = vld [vmem:[%s4547_s3] ss:$0 sm:$0xff] (%p470_p6) }
  0x15   : > { %s4571_s23 = smov (!%p433_p7, %s2873_s23), 63  ;;  %3285 = vmatprep.subr.bf16.mxu0 (%p470_p6), %v3517_v1  ;;  %3428 = vmatprep.subr.bf16.mxu1 (%p470_p6), %v3517_v1 }
  0x16   : > { %s4573_s24 = smov (!%p445_p8, %s2875_s24), 63  ;;  %s2874_s25 = sshll.u32 %s4571_s23, 2 }
  0x17   : > { %s3779_s28 = scalar_lea.vmem %s4544_s0, %s2874_s25  ;;  %s2983_s29 = sshll.u32 %s4573_s24, 5 }
  0x18   : > { %s3784_s12 = scalar_lea.vmem %s4545_s1, %s2983_s29  ;;  %3286 = vmatpush3.bf16.msra.mxu0 (%p470_p6), %v3517_v1  ;;  %3436 = vmatpush3.bf16.msra.mxu1 (%p470_p6), %v3517_v1  ;;  %v3524_v4 = vld [vmem:[%s3779_s28] sm:$0xff] (%p470_p6)   ;;  %v3526_v10 = vld [vmem:[%s3779_s28 + $0x8] sm:$0xff] (%p470_p6)   ;;  %v3528_v12 = vld [vmem:[%s3779_s28 + $0x10] sm:$0xff] (%p470_p6)  }
  0x19   : > { %s459_s21 = scalar_select %p458_p9, %s3660_s13, 0 }
  0x1a   : > { %475 = sbr.rel (!%p470_p6) target bundleno = 333 (0x14d), region = 64  ;;  %3287 = vmatprep.subr.bf16.mxu0 (%p470_p6), %v3518_v2  ;;  %3429 = vmatprep.subr.bf16.mxu1 (%p470_p6), %v3518_v2  ;;  %v3525_v5 = vld [vmem:[%s3779_s28 + $0x40] sm:$0xff] (%p470_p6)   ;;  %v3527_v11 = vld [vmem:[%s3779_s28 + $0x48] sm:$0xff] (%p470_p6)   ;;  %v3529_v13 = vld [vmem:[%s3779_s28 + $0x50] sm:$0xff] (%p470_p6)  }
  0x1b   : > { %s2878_s19 = sshll.u32 %s459_s21, 5  ;;  %3299 = vmatprep.mubr.bf16.mxu0 (%p470_p6), %v3524_v4  ;;  %3315 = vmatprep.mubr.bf16.mxu1 (%p470_p6), %v3525_v5  ;;  %v3530_v14 = vld [vmem:[%s3779_s28 + $0x18] sm:$0xff] (%p470_p6)   ;;  %v3532_v16 = vld [vmem:[%s3779_s28 + $0x20] sm:$0xff] (%p470_p6)   ;;  %v3534_v18 = vld [vmem:[%s3779_s28 + $0x28] sm:$0xff] (%p470_p6)  }
  0x1c   : > { %p461_p10 = scmp.lt.s32.totalorder %s2878_s19, 63  ;;  %3288 = vmatpush3.bf16.msra.mxu0 (%p470_p6), %v3518_v2  ;;  %3437 = vmatpush3.bf16.msra.mxu1 (%p470_p6), %v3518_v2  ;;  %v3531_v15 = vld [vmem:[%s3779_s28 + $0x58] sm:$0xff] (%p470_p6)   ;;  %v3533_v17 = vld [vmem:[%s3779_s28 + $0x60] sm:$0xff] (%p470_p6)   ;;  %v3535_v19 = vld [vmem:[%s3779_s28 + $0x68] sm:$0xff] (%p470_p6)  }
  0x1d   : > { %3289 = vmatprep.subr.bf16.mxu0 (%p470_p6), %v3519_v3  ;;  %3430 = vmatprep.subr.bf16.mxu1 (%p470_p6), %v3519_v3  ;;  %v3536_v20 = vld [vmem:[%s3779_s28 + $0x30] sm:$0xff] (%p470_p6)   ;;  %v3538_v22 = vld [vmem:[%s3779_s28 + $0x38] sm:$0xff] (%p470_p6)  }
  0x1e   : > { %s4575_s19 = smov (!%p461_p10, %s2878_s19), 63  ;;  %v3537_v21 = vld [vmem:[%s3779_s28 + $0x70] sm:$0xff] (%p470_p6)   ;;  %v3539_v23 = vld [vmem:[%s3779_s28 + $0x78] sm:$0xff] (%p470_p6)  }
  0x1f   : > { %s2879_s22 = sshll.u32 %s4575_s19, 3  ;;  %s1044_s19 = sshra.s32 (%p470_p6), %s3770_s20, 4 }
  0x20   : > { %s3792_s23 = scalar_lea.vmem %s4554_s10, %s2879_s22  ;;  %3290 = vmatpush3.bf16.msra.mxu0 (%p470_p6), %v3519_v3  ;;  %3438 = vmatpush3.bf16.msra.mxu1 (%p470_p6), %v3519_v3  ;;  %s3930_s29 = sshll.u32 (%p470_p6), %s1044_s19, 3 }
  0x21   : > { %3291 = vmatprep.subr.bf16.mxu0 %v3520_v6  ;;  %3431 = vmatprep.subr.bf16.mxu1 %v3520_v6  ;;  %s3970_s30 = scalar_lea.vmem [#allocation2], %s3930_s29 }
  0x24   : > { %3292 = vmatpush3.bf16.msra.mxu0 %v3520_v6  ;;  %3439 = vmatpush3.bf16.msra.mxu1 %v3520_v6 }
  0x25   : > { %3293 = vmatprep.subr.bf16.mxu0 %v3521_v7  ;;  %3432 = vmatprep.subr.bf16.mxu1 %v3521_v7 }
  0x28   : > { %3294 = vmatpush3.bf16.msra.mxu0 %v3521_v7  ;;  %3440 = vmatpush3.bf16.msra.mxu1 %v3521_v7 }
  0x29   : > { %3295 = vmatprep.subr.bf16.mxu0 %v3522_v8  ;;  %3433 = vmatprep.subr.bf16.mxu1 %v3522_v8 }
  0x2c   : > { %3296 = vmatpush3.bf16.msra.mxu0 %v3522_v8  ;;  %3441 = vmatpush3.bf16.msra.mxu1 %v3522_v8 }
  0x2d   : > { %3297 = vmatprep.subr.bf16.mxu0 %v3523_v9  ;;  %3434 = vmatprep.subr.bf16.mxu1 %v3523_v9 }
  0x30   : > { %3298 = vmatpush3.bf16.msra.mxu0 %v3523_v9  ;;  %3442 = vmatpush3.bf16.msra.mxu1 %v3523_v9 }
  0x33   : > { %3300 = vmatmul.mubr.bf16.vlgmr.msra.gmra.mrb[0].mxu0 %v3526_v10  ;;  %3316 = vmatmul.mubr.bf16.vlgmr.msra.gmra.mrb[0].mxu1 %v3527_v11 }
  0x34   : > { %3303 = vmatprep.mubr.bf16.mxu0 %v3528_v12  ;;  %3319 = vmatprep.mubr.bf16.mxu1 %v3529_v13 }
  0x3b   : > { %3304 = vmatmul.mubr.bf16.gmra.mrb[4].mxu0 %v3530_v14  ;;  %3320 = vmatmul.mubr.bf16.gmra.mrb[4].mxu1 %v3531_v15 }
  0x3c   : > { %3307 = vmatprep.mubr.bf16.mxu0 %v3532_v16  ;;  %3323 = vmatprep.mubr.bf16.mxu1 %v3533_v17 }
  0x43   : > { %3308 = vmatmul.mubr.bf16.gmra.mrb[8].mxu0 %v3534_v18  ;;  %3324 = vmatmul.mubr.bf16.gmra.mrb[8].mxu1 %v3535_v19 }
  0x44   : > { %3311 = vmatprep.mubr.bf16.mxu0 %v3536_v20  ;;  %3327 = vmatprep.mubr.bf16.mxu1 %v3537_v21 }
  0x4b   : > { %3312 = vmatmul.mubr.bf16.gmra.mrb[12].mxu0 %v3538_v22  ;;  %3328 = vmatmul.mubr.bf16.gmra.mrb[12].mxu1 %v3539_v23 }
 0x106   : > { %v3301_v25 = vpop.f32.mrb[0].mxu0  ;;  %v3317_v26 = vpop.f32.mrb[0].mxu1 }
 0x107   : > { %v3842_v27 = vadd.f32 %v3301_v25, %v3839_v24  ;;  %v3845_v28 = vadd.f32 %v3317_v26, %v3839_v24  ;;  %v709_v29 = vpop.f32.mrb[1].mxu0  ;;  %v773_v30 = vpop.f32.mrb[1].mxu1 }
 0x108   : > { %v3848_v31 = vadd.f32 %v3839_v24, %v709_v29  ;;  %v3851_v32 = vadd.f32 %v3839_v24, %v773_v30  ;;  %v3302_v33 = vpop.f32.mrb[2].mxu0  ;;  %v3318_v34 = vpop.f32.mrb[2].mxu1 }
 0x109   : > { %v870_v35 = vmin.f32 %v3842_v27, 0.0  ;;  %v886_v36 = vmin.f32 %v3845_v28, 0.0  ;;  %v712_v37 = vpop.f32.mrb[3].mxu0  ;;  %v776_v38 = vpop.f32.mrb[3].mxu1  ;;  %v3858_v43 = vadd.f32 %v3302_v33, %v3839_v24  ;;  %v3861_v44 = vadd.f32 %v3318_v34, %v3839_v24 }
 0x10a   : > { %v868_v39 = vmin.f32 %v3848_v31, 0.0  ;;  %v884_v40 = vmin.f32 %v3851_v32, 0.0  ;;  %v3864_v47 = vadd.f32 %v3839_v24, %v712_v37  ;;  %v3867_v48 = vadd.f32 %v3839_v24, %v776_v38 }
 0x10b   : > { %v904_v41 = vmul.f32 1.442695, %v870_v35  ;;  %v936_v42 = vmul.f32 1.442695, %v886_v36  ;;  %v871_v49 = vmin.f32 %v3858_v43, 0.0  ;;  %v887_v50 = vmin.f32 %v3861_v44, 0.0 }
 0x10c   : > { %v900_v45 = vmul.f32 1.442695, %v868_v39  ;;  %v932_v46 = vmul.f32 1.442695, %v884_v40  ;;  %v869_v51 = vmin.f32 %v3864_v47, 0.0  ;;  %v885_v55 = vmin.f32 %v3867_v48, 0.0 }
 0x10d   : > { %3540 = vpow2.f32 %v904_v41  ;;  %v906_v54 = vmul.f32 1.442695, %v871_v49  ;;  %v938_v58 = vmul.f32 1.442695, %v887_v50  ;;  %vm838_vm0 = vcmp.gt.f32.partialorder %v3842_v27, 0.0 }
 0x10e   : > { %3542 = vpow2.f32 %v936_v42  ;;  %v3305_v52 = vpop.f32.mrb[4].mxu0  ;;  %v3321_v53 = vpop.f32.mrb[4].mxu1  ;;  %v902_v59 = vmul.f32 1.442695, %v869_v51  ;;  %v934_v63 = vmul.f32 1.442695, %v885_v55 }
 0x10f   : > { %3544 = vpow2.f32 %v900_v45  ;;  %v725_v56 = vpop.f32.mrb[5].mxu0  ;;  %v789_v57 = vpop.f32.mrb[5].mxu1  ;;  %v3874_v60 = vadd.f32 %v3305_v52, %v3839_v24  ;;  %v3877_v0 = vadd.f32 %v3321_v53, %v3839_v24  ;;  %vm854_vm1 = vcmp.gt.f32.partialorder %v3845_v28, 0.0 }
 0x110   : > { %3546 = vpow2.f32 %v932_v46  ;;  %v3306_v61 = vpop.f32.mrb[6].mxu0  ;;  %v3322_v62 = vpop.f32.mrb[6].mxu1  ;;  %v3880_v1 = vadd.f32 %v3839_v24, %v725_v56  ;;  %v3884_v5 = vadd.f32 %v3839_v24, %v789_v57  ;;  %vm836_vm2 = vcmp.gt.f32.partialorder %v3848_v31, 0.0 }
 0x111   : > { %3548 = vpow2.f32 %v906_v54  ;;  %v728_v2 = vpop.f32.mrb[7].mxu0  ;;  %v792_v3 = vpop.f32.mrb[7].mxu1  ;;  %v874_v4 = vmin.f32 %v3874_v60, 0.0  ;;  %v890_v6 = vmin.f32 %v3877_v0, 0.0  ;;  %v3892_v11 = vadd.f32 %v3306_v61, %v3839_v24 }
 0x112   : > { %3550 = vpow2.f32 %v938_v58  ;;  %v872_v8 = vmin.f32 %v3880_v1, 0.0  ;;  %v888_v10 = vmin.f32 %v3884_v5, 0.0  ;;  %v3895_v12 = vadd.f32 %v3322_v62, %v3839_v24 }
 0x113   : > { %3552 = vpow2.f32 %v902_v59  ;;  %v912_v7 = vmul.f32 1.442695, %v874_v4  ;;  %v944_v9 = vmul.f32 1.442695, %v890_v6  ;;  %v3899_v14 = vadd.f32 %v3839_v24, %v728_v2 }
 0x114   : > { %3554 = vpow2.f32 %v934_v63  ;;  %v908_v13 = vmul.f32 1.442695, %v872_v8  ;;  %vm852_vm3 = vcmp.gt.f32.partialorder %v3851_v32, 0.0  ;;  %vm839_vm4 = vcmp.gt.f32.partialorder %v3858_v43, 0.0 }
 0x115   : > { %3556 = vpow2.f32 %v912_v7  ;;  %v940_v18 = vmul.f32 1.442695, %v888_v10  ;;  %v875_v19 = vmin.f32 %v3892_v11, 0.0  ;;  %vm855_vm5 = vcmp.gt.f32.partialorder %v3861_v44, 0.0 }
 0x116   : > { %v3309_v15 = vpop.f32.mrb[8].mxu0  ;;  %v3325_v16 = vpop.f32.mrb[8].mxu1  ;;  %3558 = vpow2.f32 %v944_v9  ;;  %v891_v25 = vmin.f32 %v3895_v12, 0.0  ;;  %v3916_v35 = vadd.f32 %v3839_v24, %v792_v3  ;;  %vm837_vm6 = vcmp.gt.f32.partialorder %v3864_v47, 0.0 }
 0x117   : > { %v3541_v17 = vpop.eup %3540  ;;  %v3904_v20 = vpop.f32.mrb[9].mxu0  ;;  %3560 = vpow2.f32 %v908_v13  ;;  %v914_v34 = vmul.f32 1.442695, %v875_v19  ;;  %v873_v41 = vmin.f32 %v3899_v14, 0.0  ;;  %vm853_vm7 = vcmp.gt.f32.partialorder %v3867_v48, 0.0 }
 0x118   : > { %v3906_v21 = vpop.f32.mrb[9].mxu1  ;;  %v3543_v22 = vpop.eup %3542  ;;  %v2909_v23 = vadd.f32 -1.0, %v3541_v17  ;;  %3562 = vpow2.f32 %v940_v18  ;;  %v946_v40 = vmul.f32 1.442695, %v891_v25  ;;  %vm842_vm8 = vcmp.gt.f32.partialorder %v3874_v60, 0.0 }
 0x119   : > { %v3911_v26 = vpop.f32.mrb[10].mxu0  ;;  %v3913_v29 = vpop.f32.mrb[10].mxu1  ;;  %v2925_v33 = vadd.f32 -1.0, %v3543_v22  ;;  %3564 = vpow2.f32 %v914_v34  ;;  %v910_v52 = vmul.f32 1.442695, %v873_v41  ;;  %v3939_v55 = vadd.f32 %v3309_v15, %v3839_v24 }
 0x11a   : > { %v3545_v30 = vpop.eup %3544  ;;  %v3918_v36 = vpop.f32.mrb[11].mxu0  ;;  %v998_v45 = vsel %vm838_vm0, %v3842_v27, %v2909_v23  ;;  %3566 = vpow2.f32 %v946_v40  ;;  %v3945_v59 = vadd.f32 %v3325_v16, %v3839_v24  ;;  %vm858_vm9 = vcmp.gt.f32.partialorder %v3877_v0, 0.0 }
 0x11b   : > { %v3920_v37 = vpop.f32.mrb[11].mxu1  ;;  %v3547_v38 = vpop.eup %3546  ;;  %v2907_v39 = vadd.f32 -1.0, %v3545_v30  ;;  %v1014_v46 = vsel %vm854_vm1, %v3845_v28, %v2925_v33  ;;  %v889_v28 = vmin.f32 %v3916_v35, 0.0  ;;  %3568 = vpow2.f32 %v910_v52 }
 0x11c   : > { %v3549_v42 = vpop.eup %3548  ;;  %v2923_v50 = vadd.f32 -1.0, %v3547_v38  ;;  %v878_v10 = vmin.f32 %v3939_v55, 0.0  ;;  %vm840_vm10 = vcmp.gt.f32.partialorder %v3880_v1, 0.0  ;;  %vm856_vm11 = vcmp.gt.f32.partialorder %v3884_v5, 0.0 }
 0x11d   : > { %v3551_v49 = vpop.eup %3550  ;;  %v2910_v51 = vadd.f32 -1.0, %v3549_v42  ;;  %v996_v27 = vsel %vm836_vm2, %v3848_v31, %v2907_v39  ;;  %v942_v3 = vmul.f32 1.442695, %v889_v28  ;;  %vm843_vm12 = vcmp.gt.f32.partialorder %v3892_v11, 0.0 }
 0x11e   : > { %v3553_v53 = vpop.eup %3552  ;;  %v2926_v54 = vadd.f32 -1.0, %v3551_v49  ;;  %v3947_v61 = vpop.f32.mrb[12].mxu0  ;;  %v1012_v7 = vsel %vm852_vm3, %v3851_v32, %v2923_v50  ;;  %v920_v23 = vmul.f32 1.442695, %v878_v10  ;;  %v3989_v30 = vadd.f32 %v3839_v24, %v3904_v20 }
 0x11f   : > { %v3555_v56 = vpop.eup %3554  ;;  %v999_v57 = vsel %vm839_vm4, %v3858_v43, %v2910_v51  ;;  %v2908_v58 = vadd.f32 -1.0, %v3553_v53  ;;  %v3949_v31 = vpop.f32.mrb[12].mxu1  ;;  %3570 = vpow2.f32 %v942_v3  ;;  %vm859_vm13 = vcmp.gt.f32.partialorder %v3895_v12, 0.0 }
 0x120   : > { %v1029_v62 = vpack.c.bf16 %v999_v57, %v998_v45  ;;  %v1015_v63 = vsel %vm855_vm5, %v3861_v44, %v2926_v54  ;;  %v2924_v2 = vadd.f32 -1.0, %v3555_v56  ;;  %v3954_v4 = vpop.f32.mrb[13].mxu0  ;;  %v3956_v43 = vpop.f32.mrb[13].mxu1  ;;  %vm841_vm14 = vcmp.gt.f32.partialorder %v3899_v14, 0.0 }
 0x121   : > { %v3557_v6 = vpop.eup %3556  ;;  %v1037_v8 = vpack.c.bf16 %v1015_v63, %v1014_v46  ;;  %v997_v9 = vsel %vm837_vm6, %v3864_v47, %v2908_v58  ;;  %v3965_v13 = vpop.f32.mrb[14].mxu0  ;;  %v3996_v34 = vadd.f32 %v3839_v24, %v3906_v21  ;;  %vm857_vm15 = vcmp.gt.f32.partialorder %v3916_v35, 0.0 }
 0x122   : > { %v3967_v44 = vpop.f32.mrb[14].mxu1  ;;  %v3559_v15 = vpop.eup %3558  ;;  %1049 = vst [vmem:[%s3970_s30 + $0x8] sm:$0xff] %v1029_v62  ;;  %v1028_v16 = vpack.c.bf16 %v997_v9, %v996_v27  ;;  %v1013_v32 = vsel %vm853_vm7, %v3867_v48, %v2924_v2  ;;  %v2913_v17 = vadd.f32 -1.0, %v3557_v6  ;;  %v894_v48 = vmin.f32 %v3945_v59, 0.0 }
 0x123   : > { %v3976_v47 = vpop.f32.mrb[15].mxu0  ;;  %v3978_v18 = vpop.f32.mrb[15].mxu1  ;;  %1057 = vst [vmem:[%s3970_s30 + $0x48] sm:$0xff] %v1037_v8  ;;  %v1036_v22 = vpack.c.bf16 %v1013_v32, %v1012_v7  ;;  %v2929_v33 = vadd.f32 -1.0, %v3559_v15  ;;  %v876_v41 = vmin.f32 %v3989_v30, 0.0  ;;  %3572 = vpow2.f32 %v920_v23 }
 0x124   : > { %v3561_v19 = vpop.eup %3560  ;;  %1048 = vst [vmem:[%s3970_s30] sm:$0xff] %v1028_v16  ;;  %v1002_v39 = vsel %vm842_vm8, %v3874_v60, %v2913_v17  ;;  %v952_v20 = vmul.f32 1.442695, %v894_v48  ;;  %v892_v49 = vmin.f32 %v3996_v34, 0.0  ;;  %v4006_v51 = vadd.f32 %v3911_v26, %v3839_v24 }
 0x125   : > { %v3563_v25 = vpop.eup %3562  ;;  %1056 = vst [vmem:[%s3970_s30 + $0x40] sm:$0xff] %v1036_v22  ;;  %v2911_v40 = vadd.f32 -1.0, %v3561_v19  ;;  %v916_v21 = vmul.f32 1.442695, %v876_v41  ;;  %v4013_v27 = vadd.f32 %v3913_v29, %v3839_v24  ;;  %v4017_v54 = vadd.f32 %v3839_v24, %v3918_v36 }
 0x126   : > { %v3565_v38 = vpop.eup %3564  ;;  %v2927_v45 = vadd.f32 -1.0, %v3563_v25  ;;  %3574 = vpow2.f32 %v952_v20  ;;  %v948_v53 = vmul.f32 1.442695, %v892_v49  ;;  %v1018_v26 = vsel %vm858_vm9, %v3877_v0, %v2929_v33 }
 0x127   : > { %v3567_v42 = vpop.eup %3566  ;;  %v2914_v46 = vadd.f32 -1.0, %v3565_v38  ;;  %v1000_v29 = vsel %vm840_vm10, %v3880_v1, %v2911_v40  ;;  %3576 = vpow2.f32 %v916_v21  ;;  %v879_v58 = vmin.f32 %v4006_v51, 0.0 }
 0x128   : > { %v2930_v50 = vadd.f32 -1.0, %v3567_v42  ;;  %v3569_v60 = vpop.eup %3568  ;;  %v1016_v0 = vsel %vm856_vm11, %v3884_v5, %v2927_v45  ;;  %3578 = vpow2.f32 %v948_v53  ;;  %v895_v62 = vmin.f32 %v4013_v27, 0.0 }
 0x129   : > { %v1003_v52 = vsel %vm843_vm12, %v3892_v11, %v2914_v46  ;;  %v2912_v11 = vadd.f32 -1.0, %v3569_v60  ;;  %v3571_v36 = vpop.eup %3570  ;;  %v922_v2 = vmul.f32 1.442695, %v879_v58  ;;  %v877_v3 = vmin.f32 %v4017_v54, 0.0 }
 0x12a   : > { %v1031_v28 = vpack.c.bf16 %v1003_v52, %v1002_v39  ;;  %v1019_v56 = vsel %vm859_vm13, %v3895_v12, %v2930_v50  ;;  %v2928_v63 = vadd.f32 -1.0, %v3571_v36  ;;  %v954_v6 = vmul.f32 1.442695, %v895_v62 }
 0x12b   : > { %v1039_v57 = vpack.c.bf16 %v1019_v56, %v1018_v26  ;;  %v1001_v12 = vsel %vm841_vm14, %v3899_v14, %v2912_v11  ;;  %v4041_v7 = vadd.f32 %v3839_v24, %v3920_v37  ;;  %v4045_v5 = vadd.f32 %v3947_v61, %v3839_v24 }
 0x12c   : > { %1051 = vst [vmem:[%s3970_s30 + $0x18] sm:$0xff] %v1031_v28  ;;  %v1030_v1 = vpack.c.bf16 %v1001_v12, %v1000_v29  ;;  %v4049_v14 = vadd.f32 %v3949_v31, %v3839_v24  ;;  %v1017_v8 = vsel %vm857_vm15, %v3916_v35, %v2928_v63  ;;  %3580 = vpow2.f32 %v922_v2 }
 0x12d   : > { %1059 = vst [vmem:[%s3970_s30 + $0x58] sm:$0xff] %v1039_v57  ;;  %v918_v9 = vmul.f32 1.442695, %v877_v3  ;;  %v4057_v10 = vadd.f32 %v3839_v24, %v3954_v4  ;;  %v1038_v37 = vpack.c.bf16 %v1017_v8, %v1016_v0  ;;  %3582 = vpow2.f32 %v954_v6  ;;  %v3573_v15 = vpop.eup %3572 }
 0x12e   : > { %1050 = vst [vmem:[%s3970_s30 + $0x10] sm:$0xff] %v1030_v1  ;;  %v893_v61 = vmin.f32 %v4041_v7, 0.0  ;;  %v882_v31 = vmin.f32 %v4045_v5, 0.0  ;;  %v898_v32 = vmin.f32 %v4049_v14, 0.0  ;;  %v2917_v22 = vadd.f32 -1.0, %v3573_v15 }
 0x12f   : > { %3584 = vpow2.f32 %v918_v9  ;;  %1058 = vst [vmem:[%s3970_s30 + $0x50] sm:$0xff] %v1038_v37  ;;  %v880_v19 = vmin.f32 %v4057_v10, 0.0  ;;  %v4066_v4 = vadd.f32 %v3839_v24, %v3956_v43  ;;  %v4070_v25 = vadd.f32 %v3965_v13, %v3839_v24 }
 0x130   : > { %v3575_v16 = vpop.eup %3574  ;;  %v950_v17 = vmul.f32 1.442695, %v893_v61  ;;  %v928_v35 = vmul.f32 1.442695, %v882_v31  ;;  %v960_v23 = vmul.f32 1.442695, %v898_v32  ;;  %v4076_v33 = vadd.f32 %v3967_v44, %v3839_v24 }
 0x131   : > { %v3577_v48 = vpop.eup %3576  ;;  %vm846_vm0 = vcmp.gt.f32.partialorder %v3939_v55, 0.0  ;;  %vm862_vm1 = vcmp.gt.f32.partialorder %v3945_v59, 0.0  ;;  %v2933_v39 = vadd.f32 -1.0, %v3575_v16  ;;  %vm844_vm2 = vcmp.gt.f32.partialorder %v3989_v30, 0.0 }
 0x132   : > { %3586 = vpow2.f32 %v950_v17  ;;  %v3579_v38 = vpop.eup %3578  ;;  %v924_v43 = vmul.f32 1.442695, %v880_v19  ;;  %v896_v40 = vmin.f32 %v4066_v4, 0.0  ;;  %vm847_vm3 = vcmp.gt.f32.partialorder %v4006_v51, 0.0 }
 0x133   : > { %vm863_vm4 = vcmp.gt.f32.partialorder %v4013_v27, 0.0  ;;  %3588 = vpow2.f32 %v928_v35  ;;  %v883_v13 = vmin.f32 %v4070_v25, 0.0  ;;  %v1006_v20 = vsel %vm846_vm0, %v3939_v55, %v2917_v22 }
 0x134   : > { %vm845_vm5 = vcmp.gt.f32.partialorder %v4017_v54, 0.0  ;;  %3590 = vpow2.f32 %v960_v23  ;;  %v956_v44 = vmul.f32 1.442695, %v896_v40  ;;  %v899_v45 = vmin.f32 %v4076_v33, 0.0 }
 0x135   : > { %v930_v42 = vmul.f32 1.442695, %v883_v13  ;;  %v4088_v46 = vadd.f32 %v3839_v24, %v3976_v47  ;;  %v4092_v49 = vadd.f32 %v3839_v24, %v3978_v18  ;;  %v1022_v55 = vsel %vm862_vm1, %v3945_v59, %v2933_v39 }
 0x136   : > { %v3581_v41 = vpop.eup %3580  ;;  %v2915_v21 = vadd.f32 -1.0, %v3577_v48  ;;  %3592 = vpow2.f32 %v924_v43  ;;  %v2931_v53 = vadd.f32 -1.0, %v3579_v38  ;;  %v962_v28 = vmul.f32 1.442695, %v899_v45 }
 0x137   : > { %v3583_v50 = vpop.eup %3582  ;;  %v2918_v60 = vadd.f32 -1.0, %v3581_v41  ;;  %3594 = vpow2.f32 %v930_v42  ;;  %v881_v18 = vmin.f32 %v4088_v46, 0.0  ;;  %v897_v11 = vmin.f32 %v4092_v49, 0.0 }
 0x138   : > { %v2934_v26 = vadd.f32 -1.0, %v3583_v50  ;;  %3596 = vpow2.f32 %v956_v44  ;;  %v1004_v29 = vsel %vm844_vm2, %v3989_v30, %v2915_v21  ;;  %vm860_vm6 = vcmp.gt.f32.partialorder %v3996_v34, 0.0 }
 0x139   : > { %v3585_v52 = vpop.eup %3584  ;;  %v1007_v47 = vsel %vm847_vm3, %v4006_v51, %v2918_v60  ;;  %3598 = vpow2.f32 %v962_v28  ;;  %v926_v58 = vmul.f32 1.442695, %v881_v18  ;;  %v958_v12 = vmul.f32 1.442695, %v897_v11 }
 0x13a   : > { %v2916_v24 = vadd.f32 -1.0, %v3585_v52  ;;  %v1033_v56 = vpack.c.bf16 %v1007_v47, %v1006_v20  ;;  %v1023_v59 = vsel %vm863_vm4, %v4013_v27, %v2934_v26  ;;  %vm861_vm7 = vcmp.gt.f32.partialorder %v4041_v7, 0.0 }
 0x13b   : > { %v1041_v57 = vpack.c.bf16 %v1023_v59, %v1022_v55  ;;  %3600 = vpow2.f32 %v926_v58  ;;  %v1020_v1 = vsel %vm860_vm6, %v3996_v34, %v2931_v53  ;;  %vm850_vm8 = vcmp.gt.f32.partialorder %v4045_v5, 0.0 }
 0x13c   : > { %v1005_v51 = vsel %vm845_vm5, %v4017_v54, %v2916_v24  ;;  %v3587_v36 = vpop.eup %3586  ;;  %1053 = vst [vmem:[%s3970_s30 + $0x28] sm:$0xff] %v1033_v56  ;;  %3602 = vpow2.f32 %v958_v12  ;;  %vm851_vm9 = vcmp.gt.f32.partialorder %v4070_v25, 0.0  ;;  %vm866_vm10 = vcmp.gt.f32.partialorder %v4049_v14, 0.0 }
 0x13d   : > { %v1032_v0 = vpack.c.bf16 %v1005_v51, %v1004_v29  ;;  %1061 = vst [vmem:[%s3970_s30 + $0x68] sm:$0xff] %v1041_v57  ;;  %v2932_v27 = vadd.f32 -1.0, %v3587_v36  ;;  %v3589_v62 = vpop.eup %3588  ;;  %vm867_vm11 = vcmp.gt.f32.partialorder %v4076_v33, 0.0  ;;  %vm848_vm12 = vcmp.gt.f32.partialorder %v4057_v10, 0.0 }
 0x13e   : > { %v3591_v30 = vpop.eup %3590  ;;  %v2921_v3 = vadd.f32 -1.0, %v3589_v62  ;;  %vm849_vm13 = vcmp.gt.f32.partialorder %v4088_v46, 0.0  ;;  %vm864_vm14 = vcmp.gt.f32.partialorder %v4066_v4, 0.0  ;;  %vm865_vm15 = vcmp.gt.f32.partialorder %v4092_v49, 0.0 }
 0x13f   : > { %1052 = vst [vmem:[%s3970_s30 + $0x20] sm:$0xff] %v1032_v0  ;;  %v1021_v54 = vsel %vm861_vm7, %v4041_v7, %v2932_v27  ;;  %v2937_v9 = vadd.f32 -1.0, %v3591_v30 }
 0x140   : > { %v1040_v63 = vpack.c.bf16 %v1021_v54, %v1020_v1  ;;  %v3593_v2 = vpop.eup %3592  ;;  %v1010_v61 = vsel %vm850_vm8, %v4045_v5, %v2921_v3 }
 0x141   : > { %v3595_v6 = vpop.eup %3594  ;;  %v2919_v7 = vadd.f32 -1.0, %v3593_v2  ;;  %v1026_v17 = vsel %vm866_vm10, %v4049_v14, %v2937_v9 }
 0x142   : > { %1060 = vst [vmem:[%s3970_s30 + $0x60] sm:$0xff] %v1040_v63  ;;  %v3597_v8 = vpop.eup %3596  ;;  %v2922_v37 = vadd.f32 -1.0, %v3595_v6 }
 0x143   : > { %v3599_v15 = vpop.eup %3598  ;;  %v2935_v35 = vadd.f32 -1.0, %v3597_v8  ;;  %v1008_v48 = vsel %vm848_vm12, %v4057_v10, %v2919_v7 }
 0x144   : > { %v1011_v34 = vsel %vm851_vm9, %v4070_v25, %v2922_v37  ;;  %v2938_v31 = vadd.f32 -1.0, %v3599_v15 }
 0x145   : > { %v1035_v16 = vpack.c.bf16 %v1011_v34, %v1010_v61  ;;  %v3601_v32 = vpop.eup %3600 }
 0x146   : > { %v1027_v19 = vsel %vm867_vm11, %v4076_v33, %v2938_v31  ;;  %v3603_v22 = vpop.eup %3602  ;;  %v2920_v23 = vadd.f32 -1.0, %v3601_v32  ;;  %v1024_v33 = vsel %vm864_vm14, %v4066_v4, %v2935_v35 }
 0x147   : > { %1055 = vst [vmem:[%s3970_s30 + $0x38] sm:$0xff] %v1035_v16  ;;  %v1043_v5 = vpack.c.bf16 %v1027_v19, %v1026_v17  ;;  %v2936_v25 = vadd.f32 -1.0, %v3603_v22 }
 0x148   : > { %v1009_v14 = vsel %vm849_vm13, %v4088_v46, %v2920_v23 }
 0x149   : > { %1063 = vst [vmem:[%s3970_s30 + $0x78] sm:$0xff] %v1043_v5  ;;  %v1034_v38 = vpack.c.bf16 %v1009_v14, %v1008_v48  ;;  %v1025_v39 = vsel %vm865_vm15, %v4092_v49, %v2936_v25 }
 0x14a   : > { %v1042_v43 = vpack.c.bf16 %v1025_v39, %v1024_v33 }
 0x14b   : > { %1054 = vst [vmem:[%s3970_s30 + $0x30] sm:$0xff] %v1034_v38 }
 0x14c   : > { %1062 = vst [vmem:[%s3970_s30 + $0x70] sm:$0xff] %v1042_v43 }
 0x14d PF: > { %p2940_p11 = scmp.ne.s32.totalorder %s3664_s14, 1 }
 0x14e   : > { %p1068_p12 = scmp.eq.s32.totalorder (!%p2940_p11), %s3660_s13, 0 }
 0x14f   : > { %1067 = sbr.rel (%p2940_p11) target bundleno = 742 (0x2e6), region = 68 }
 0x156   : > { %1072 = sbr.rel (!%p1068_p12) target bundleno = 349 (0x15d), region = 72  ;;  %v3678_v10 = vmov (%p1068_p12), 0.0  }
 0x157   : > { %1073 = vst [vmem:[#allocation5] sm:$0x1] (%p1068_p12), %v3678_v10  ;;  %1074 = vst [vmem:[#allocation6] sm:$0x1] (%p1068_p12), %v3678_v10 }
 0x15d PF: > { %v1347_v40 = vld [vmem:[#allocation2 + $0x40] sm:$0xff]  ;;  %v1348_v44 = vld [vmem:[#allocation2 + $0x48] sm:$0xff]  ;;  %v1349_v46 = vld [vmem:[#allocation2 + $0x50] sm:$0xff]  ;;  %s1808_s11 = sshra.s32 %s3770_s20, 4 }
 0x15e   : > { %v1363_v13 = vld [vmem:[#allocation2 + $0xc0] sm:$0xff]  ;;  %3011 = vmatprep.subr.bf16.mxu0 %v1347_v40  ;;  %v1364_v41 = vld [vmem:[#allocation2 + $0xc8] sm:$0xff]  ;;  %v1365_v49 = vld [vmem:[#allocation2 + $0xd0] sm:$0xff]  ;;  %s2942_s21 = sshll.u32 %s1808_s11, 3 }
 0x15f   : > { %v1339_v4 = vld [vmem:[#allocation2] sm:$0xff]  ;;  %3123 = vmatprep.subr.bf16.mxu1 %v1363_v13  ;;  %v1340_v42 = vld [vmem:[#allocation2 + $0x8] sm:$0xff]  ;;  %v1341_v50 = vld [vmem:[#allocation2 + $0x10] sm:$0xff] }
 0x160   : > { %v1355_v20 = vld [vmem:[#allocation2 + $0x80] sm:$0xff]  ;;  %3012 = vmatpush3.bf16.msra.mxu0 %v1339_v4  ;;  %v1356_v45 = vld [vmem:[#allocation2 + $0x88] sm:$0xff]  ;;  %v1357_v55 = vld [vmem:[#allocation2 + $0x90] sm:$0xff] }
 0x161   : > { %3124 = vmatpush3.bf16.msra.mxu1 %v1355_v20  ;;  %3013 = vmatprep.subr.bf16.mxu0 %v1348_v44  ;;  %v1350_v21 = vld [vmem:[#allocation2 + $0x58] sm:$0xff]  ;;  %v1144_v26 = vld [vmem:[%s3784_s12 + $0x8] sm:$0xff]  ;;  %v1351_v18 = vld [vmem:[#allocation2 + $0x60] sm:$0xff] }
 0x162   : > { %3125 = vmatprep.subr.bf16.mxu1 %v1364_v41  ;;  %v1366_v60 = vld [vmem:[#allocation2 + $0xd8] sm:$0xff]  ;;  %v1148_v28 = vld [vmem:[%s3784_s12 + $0x28] sm:$0xff]  ;;  %v1367_v56 = vld [vmem:[#allocation2 + $0xe0] sm:$0xff] }
 0x163   : > { %v1342_v52 = vld [vmem:[#allocation2 + $0x18] sm:$0xff]  ;;  %v1272_v59 = vpack.c.bf16 %v1148_v28, %v1144_v26  ;;  %v1343_v29 = vld [vmem:[#allocation2 + $0x20] sm:$0xff]  ;;  %v1352_v51 = vld [vmem:[#allocation2 + $0x68] sm:$0xff] }
 0x164   : > { %3014 = vmatpush3.bf16.msra.mxu0 %v1340_v42  ;;  %v1358_v53 = vld [vmem:[#allocation2 + $0x98] sm:$0xff]  ;;  %v1359_v57 = vld [vmem:[#allocation2 + $0xa0] sm:$0xff]  ;;  %v1368_v58 = vld [vmem:[#allocation2 + $0xe8] sm:$0xff] }
 0x165   : > { %3126 = vmatpush3.bf16.msra.mxu1 %v1356_v45  ;;  %3015 = vmatprep.subr.bf16.mxu0 %v1349_v46  ;;  %v1146_v47 = vld [vmem:[%s3784_s12 + $0x18] sm:$0xff]  ;;  %v1344_v36 = vld [vmem:[#allocation2 + $0x28] sm:$0xff]  ;;  %v1353_v12 = vld [vmem:[#allocation2 + $0x70] sm:$0xff] }
 0x166   : > { %3127 = vmatprep.subr.bf16.mxu1 %v1365_v49  ;;  %v1150_v24 = vld [vmem:[%s3784_s12 + $0x38] sm:$0xff]  ;;  %1403 = vmatprep.mubr.bf16.mxu0 %v1272_v59  ;;  %v1360_v0 = vld [vmem:[#allocation2 + $0xa8] sm:$0xff]  ;;  %v1369_v27 = vld [vmem:[#allocation2 + $0xf0] sm:$0xff] }
 0x167   : > { %v1274_v11 = vpack.c.bf16 %v1150_v24, %v1146_v47  ;;  %v1345_v62 = vld [vmem:[#allocation2 + $0x30] sm:$0xff]  ;;  %v1354_v1 = vld [vmem:[#allocation2 + $0x78] sm:$0xff]  ;;  %v1143_v3 = vld [vmem:[%s3784_s12] sm:$0xff] }
 0x168   : > { %3016 = vmatpush3.bf16.msra.mxu0 %v1341_v50  ;;  %v1361_v30 = vld [vmem:[#allocation2 + $0xb0] sm:$0xff]  ;;  %v1370_v54 = vld [vmem:[#allocation2 + $0xf8] sm:$0xff]  ;;  %v1147_v6 = vld [vmem:[%s3784_s12 + $0x20] sm:$0xff] }
 0x169   : > { %3128 = vmatpush3.bf16.msra.mxu1 %v1357_v55  ;;  %3017 = vmatprep.subr.bf16.mxu0 %v1350_v21  ;;  %v1346_v63 = vld [vmem:[#allocation2 + $0x38] sm:$0xff]  ;;  %v1145_v8 = vld [vmem:[%s3784_s12 + $0x10] sm:$0xff]  ;;  %v1152_v37 = vld [vmem:[%s3784_s12 + $0x48] sm:$0xff]  ;;  %v1271_v31 = vpack.c.bf16 %v1147_v6, %v1143_v3 }
 0x16a   : > { %3129 = vmatprep.subr.bf16.mxu1 %v1366_v60  ;;  %1564 = vmatprep.mubr.bf16.mxu1 %v1274_v11  ;;  %v1362_v2 = vld [vmem:[#allocation2 + $0xb8] sm:$0xff]  ;;  %v1149_v9 = vld [vmem:[%s3784_s12 + $0x30] sm:$0xff]  ;;  %v1156_v15 = vld [vmem:[%s3784_s12 + $0x68] sm:$0xff] }
 0x16b   : > { %v1154_v61 = vld [vmem:[%s3784_s12 + $0x58] sm:$0xff]  ;;  %v1273_v7 = vpack.c.bf16 %v1149_v9, %v1145_v8  ;;  %v1276_v16 = vpack.c.bf16 %v1156_v15, %v1152_v37  ;;  %v1151_v17 = vld [vmem:[%s3784_s12 + $0x40] sm:$0xff]  ;;  %v1153_v19 = vld [vmem:[%s3784_s12 + $0x50] sm:$0xff] }
 0x16c   : > { %3018 = vmatpush3.bf16.msra.mxu0 %v1342_v52  ;;  %v1158_v34 = vld [vmem:[%s3784_s12 + $0x78] sm:$0xff]  ;;  %v1155_v35 = vld [vmem:[%s3784_s12 + $0x60] sm:$0xff]  ;;  %v1157_v22 = vld [vmem:[%s3784_s12 + $0x70] sm:$0xff] }
 0x16d   : > { %3130 = vmatpush3.bf16.msra.mxu1 %v1358_v53  ;;  %3019 = vmatprep.subr.bf16.mxu0 %v1351_v18  ;;  %v1278_v32 = vpack.c.bf16 %v1158_v34, %v1154_v61  ;;  %v1160_v5 = vld [vmem:[%s3784_s12 + $0x88] sm:$0xff]  ;;  %v1162_v25 = vld [vmem:[%s3784_s12 + $0x98] sm:$0xff]  ;;  %v1275_v14 = vpack.c.bf16 %v1155_v35, %v1151_v17  ;;  %v1277_v33 = vpack.c.bf16 %v1157_v22, %v1153_v19  ;;  %v1159_v43 = vld [vmem:[%s3784_s12 + $0x80] sm:$0xff] }
 0x16e   : > { %3131 = vmatprep.subr.bf16.mxu1 %v1367_v56  ;;  %v1164_v23 = vld [vmem:[%s3784_s12 + $0xa8] sm:$0xff]  ;;  %v1166_v48 = vld [vmem:[%s3784_s12 + $0xb8] sm:$0xff]  ;;  %v1163_v10 = vld [vmem:[%s3784_s12 + $0xa0] sm:$0xff] }
 0x16f   : > { %v1280_v38 = vpack.c.bf16 %v1164_v23, %v1160_v5  ;;  %v1282_v39 = vpack.c.bf16 %v1166_v48, %v1162_v25  ;;  %v1161_v40 = vld [vmem:[%s3784_s12 + $0x90] sm:$0xff]  ;;  %v1168_v4 = vld [vmem:[%s3784_s12 + $0xc8] sm:$0xff]  ;;  %v1170_v44 = vld [vmem:[%s3784_s12 + $0xd8] sm:$0xff]  ;;  %v1279_v42 = vpack.c.bf16 %v1163_v10, %v1159_v43 }
 0x170   : > { %3020 = vmatpush3.bf16.msra.mxu0 %v1343_v29  ;;  %v1165_v13 = vld [vmem:[%s3784_s12 + $0xb0] sm:$0xff]  ;;  %v1172_v20 = vld [vmem:[%s3784_s12 + $0xe8] sm:$0xff]  ;;  %v1174_v41 = vld [vmem:[%s3784_s12 + $0xf8] sm:$0xff] }
 0x171   : > { %3132 = vmatpush3.bf16.msra.mxu1 %v1359_v57  ;;  %3021 = vmatprep.subr.bf16.mxu0 %v1352_v51  ;;  %v1281_v45 = vpack.c.bf16 %v1165_v13, %v1161_v40  ;;  %v1284_v46 = vpack.c.bf16 %v1172_v20, %v1168_v4  ;;  %v1286_v49 = vpack.c.bf16 %v1174_v41, %v1170_v44  ;;  %v1167_v50 = vld [vmem:[%s3784_s12 + $0xc0] sm:$0xff]  ;;  %v1169_v21 = vld [vmem:[%s3784_s12 + $0xd0] sm:$0xff]  ;;  %v1176_v52 = vld [vmem:[%s3784_s12 + $0x108] sm:$0xff] }
 0x172   : > { %3133 = vmatprep.subr.bf16.mxu1 %v1368_v58  ;;  %v1171_v55 = vld [vmem:[%s3784_s12 + $0xe0] sm:$0xff]  ;;  %v1173_v60 = vld [vmem:[%s3784_s12 + $0xf0] sm:$0xff]  ;;  %v1180_v53 = vld [vmem:[%s3784_s12 + $0x128] sm:$0xff] }
 0x173   : > { %v1178_v26 = vld [vmem:[%s3784_s12 + $0x118] sm:$0xff]  ;;  %v1283_v47 = vpack.c.bf16 %v1171_v55, %v1167_v50  ;;  %v1285_v24 = vpack.c.bf16 %v1173_v60, %v1169_v21  ;;  %v1288_v18 = vpack.c.bf16 %v1180_v53, %v1176_v52  ;;  %v1175_v59 = vld [vmem:[%s3784_s12 + $0x100] sm:$0xff]  ;;  %v1177_v29 = vld [vmem:[%s3784_s12 + $0x110] sm:$0xff] }
 0x174   : > { %3022 = vmatpush3.bf16.msra.mxu0 %v1344_v36  ;;  %v1182_v28 = vld [vmem:[%s3784_s12 + $0x138] sm:$0xff]  ;;  %v1179_v11 = vld [vmem:[%s3784_s12 + $0x120] sm:$0xff]  ;;  %v1181_v57 = vld [vmem:[%s3784_s12 + $0x130] sm:$0xff] }
 0x175   : > { %3134 = vmatpush3.bf16.msra.mxu1 %v1360_v0  ;;  %3023 = vmatprep.subr.bf16.mxu0 %v1353_v12  ;;  %v1290_v56 = vpack.c.bf16 %v1182_v28, %v1178_v26  ;;  %v1184_v51 = vld [vmem:[%s3784_s12 + $0x148] sm:$0xff]  ;;  %v1186_v36 = vld [vmem:[%s3784_s12 + $0x158] sm:$0xff]  ;;  %v1287_v12 = vpack.c.bf16 %v1179_v11, %v1175_v59 }
 0x176   : > { %3135 = vmatprep.subr.bf16.mxu1 %v1369_v27  ;;  %v1188_v58 = vld [vmem:[%s3784_s12 + $0x168] sm:$0xff]  ;;  %v1190_v0 = vld [vmem:[%s3784_s12 + $0x178] sm:$0xff]  ;;  %v1289_v27 = vpack.c.bf16 %v1181_v57, %v1177_v29 }
 0x177   : > { %v1192_v3 = vld [vmem:[%s3784_s12 + $0x188] sm:$0xff]  ;;  %v1194_v8 = vld [vmem:[%s3784_s12 + $0x198] sm:$0xff] }
 0x178   : > { %3024 = vmatpush3.bf16.msra.mxu0 %v1345_v62  ;;  %v1292_v62 = vpack.c.bf16 %v1188_v58, %v1184_v51  ;;  %v1196_v6 = vld [vmem:[%s3784_s12 + $0x1a8] sm:$0xff]  ;;  %v1198_v9 = vld [vmem:[%s3784_s12 + $0x1b8] sm:$0xff] }
 0x179   : > { %3136 = vmatpush3.bf16.msra.mxu1 %v1361_v30  ;;  %3025 = vmatprep.subr.bf16.mxu0 %v1354_v1  ;;  %v1294_v30 = vpack.c.bf16 %v1190_v0, %v1186_v36  ;;  %v1183_v1 = vld [vmem:[%s3784_s12 + $0x140] sm:$0xff]  ;;  %v1296_v61 = vpack.c.bf16 %v1196_v6, %v1192_v3  ;;  %v1298_v34 = vpack.c.bf16 %v1198_v9, %v1194_v8  ;;  %v1200_v17 = vld [vmem:[%s3784_s12 + $0x1c8] sm:$0xff]  ;;  %v1202_v19 = vld [vmem:[%s3784_s12 + $0x1d8] sm:$0xff] }
 0x17a   : > { %3137 = vmatprep.subr.bf16.mxu1 %v1370_v54  ;;  %v1187_v54 = vld [vmem:[%s3784_s12 + $0x160] sm:$0xff]  ;;  %v1204_v35 = vld [vmem:[%s3784_s12 + $0x1e8] sm:$0xff]  ;;  %v1206_v22 = vld [vmem:[%s3784_s12 + $0x1f8] sm:$0xff] }
 0x17b   : > { %v1291_v37 = vpack.c.bf16 %v1187_v54, %v1183_v1  ;;  %v1300_v25 = vpack.c.bf16 %v1204_v35, %v1200_v17  ;;  %v1302_v48 = vpack.c.bf16 %v1206_v22, %v1202_v19  ;;  %v1208_v43 = vld [vmem:[%s3784_s12 + $0x208] sm:$0xff]  ;;  %v1210_v40 = vld [vmem:[%s3784_s12 + $0x218] sm:$0xff] }
 0x17c   : > { %3026 = vmatpush3.bf16.msra.mxu0 %v1346_v63  ;;  %v1185_v63 = vld [vmem:[%s3784_s12 + $0x150] sm:$0xff]  ;;  %v1212_v10 = vld [vmem:[%s3784_s12 + $0x228] sm:$0xff]  ;;  %v1214_v13 = vld [vmem:[%s3784_s12 + $0x238] sm:$0xff] }
 0x17d   : > { %3138 = vmatpush3.bf16.msra.mxu1 %v1362_v2  ;;  %v1189_v2 = vld [vmem:[%s3784_s12 + $0x170] sm:$0xff]  ;;  %v1304_v44 = vpack.c.bf16 %v1212_v10, %v1208_v43  ;;  %v1306_v41 = vpack.c.bf16 %v1214_v13, %v1210_v40  ;;  %v1216_v50 = vld [vmem:[%s3784_s12 + $0x248] sm:$0xff]  ;;  %v1218_v21 = vld [vmem:[%s3784_s12 + $0x258] sm:$0xff] }
 0x17e   : > { %v1293_v15 = vpack.c.bf16 %v1189_v2, %v1185_v63  ;;  %v1220_v55 = vld [vmem:[%s3784_s12 + $0x268] sm:$0xff]  ;;  %v1222_v60 = vld [vmem:[%s3784_s12 + $0x278] sm:$0xff] }
 0x17f   : > { %1404 = vmatmul.mubr.bf16.vlgmr.msra.gmra.mrb[0].mxu0 %v1271_v31  ;;  %v1191_v31 = vld [vmem:[%s3784_s12 + $0x180] sm:$0xff]  ;;  %v1308_v26 = vpack.c.bf16 %v1220_v55, %v1216_v50  ;;  %v1310_v28 = vpack.c.bf16 %v1222_v60, %v1218_v21  ;;  %v1224_v59 = vld [vmem:[%s3784_s12 + $0x288] sm:$0xff]  ;;  %v1226_v29 = vld [vmem:[%s3784_s12 + $0x298] sm:$0xff] }
 0x180   : > { %1565 = vmatmul.mubr.bf16.vlgmr.msra.gmra.mrb[0].mxu1 %v1273_v7  ;;  %1411 = vmatprep.mubr.bf16.mxu0 %v1276_v16  ;;  %v1195_v7 = vld [vmem:[%s3784_s12 + $0x1a0] sm:$0xff]  ;;  %v1193_v16 = vld [vmem:[%s3784_s12 + $0x190] sm:$0xff]  ;;  %v1228_v11 = vld [vmem:[%s3784_s12 + $0x2a8] sm:$0xff] }
 0x181   : > { %1572 = vmatprep.mubr.bf16.mxu1 %v1278_v32  ;;  %v1197_v32 = vld [vmem:[%s3784_s12 + $0x1b0] sm:$0xff]  ;;  %v1295_v5 = vpack.c.bf16 %v1195_v7, %v1191_v31  ;;  %v1230_v57 = vld [vmem:[%s3784_s12 + $0x2b8] sm:$0xff]  ;;  %v1312_v36 = vpack.c.bf16 %v1228_v11, %v1224_v59  ;;  %v1232_v1 = vld [vmem:[%s3784_s12 + $0x2c8] sm:$0xff] }
 0x182   : > { %v1297_v23 = vpack.c.bf16 %v1197_v32, %v1193_v16  ;;  %v1314_v0 = vpack.c.bf16 %v1230_v57, %v1226_v29  ;;  %v1236_v54 = vld [vmem:[%s3784_s12 + $0x2e8] sm:$0xff]  ;;  %v1234_v63 = vld [vmem:[%s3784_s12 + $0x2d8] sm:$0xff] }
 0x183   : > { %v1238_v2 = vld [vmem:[%s3784_s12 + $0x2f8] sm:$0xff]  ;;  %v1316_v8 = vpack.c.bf16 %v1236_v54, %v1232_v1  ;;  %v1240_v31 = vld [vmem:[%s3784_s12 + $0x308] sm:$0xff] }
 0x184   : > { %v1318_v9 = vpack.c.bf16 %v1238_v2, %v1234_v63  ;;  %v1244_v7 = vld [vmem:[%s3784_s12 + $0x328] sm:$0xff]  ;;  %v1242_v16 = vld [vmem:[%s3784_s12 + $0x318] sm:$0xff] }
 0x185   : > { %v1246_v32 = vld [vmem:[%s3784_s12 + $0x338] sm:$0xff]  ;;  %v1320_v19 = vpack.c.bf16 %v1244_v7, %v1240_v31 }
 0x186   : > { %v1322_v22 = vpack.c.bf16 %v1246_v32, %v1242_v16 }
 0x187   : > { %1412 = vmatmul.mubr.bf16.gmra.mrb[4].mxu0 %v1275_v14  ;;  %v1199_v14 = vld [vmem:[%s3784_s12 + $0x1c0] sm:$0xff] }
 0x188   : > { %1573 = vmatmul.mubr.bf16.gmra.mrb[4].mxu1 %v1277_v33  ;;  %1419 = vmatprep.mubr.bf16.mxu0 %v1280_v38  ;;  %v1203_v33 = vld [vmem:[%s3784_s12 + $0x1e0] sm:$0xff]  ;;  %v1201_v38 = vld [vmem:[%s3784_s12 + $0x1d0] sm:$0xff] }
 0x189   : > { %1580 = vmatprep.mubr.bf16.mxu1 %v1282_v39  ;;  %v1205_v39 = vld [vmem:[%s3784_s12 + $0x1f0] sm:$0xff]  ;;  %v1299_v4 = vpack.c.bf16 %v1203_v33, %v1199_v14  ;;  %v1248_v14 = vld [vmem:[%s3784_s12 + $0x348] sm:$0xff] }
 0x18a   : > { %v1301_v20 = vpack.c.bf16 %v1205_v39, %v1201_v38  ;;  %v1252_v33 = vld [vmem:[%s3784_s12 + $0x368] sm:$0xff]  ;;  %v1250_v38 = vld [vmem:[%s3784_s12 + $0x358] sm:$0xff] }
 0x18b   : > { %v1254_v39 = vld [vmem:[%s3784_s12 + $0x378] sm:$0xff]  ;;  %v1324_v40 = vpack.c.bf16 %v1252_v33, %v1248_v14 }
 0x18c   : > { %v1326_v13 = vpack.c.bf16 %v1254_v39, %v1250_v38 }
 0x18f   : > { %1420 = vmatmul.mubr.bf16.gmra.mrb[8].mxu0 %v1279_v42  ;;  %v1207_v42 = vld [vmem:[%s3784_s12 + $0x200] sm:$0xff] }
 0x190   : > { %1581 = vmatmul.mubr.bf16.gmra.mrb[8].mxu1 %v1281_v45  ;;  %1427 = vmatprep.mubr.bf16.mxu0 %v1284_v46  ;;  %v1211_v45 = vld [vmem:[%s3784_s12 + $0x220] sm:$0xff]  ;;  %v1209_v46 = vld [vmem:[%s3784_s12 + $0x210] sm:$0xff] }
 0x191   : > { %1588 = vmatprep.mubr.bf16.mxu1 %v1286_v49  ;;  %v1213_v49 = vld [vmem:[%s3784_s12 + $0x230] sm:$0xff]  ;;  %v1303_v52 = vpack.c.bf16 %v1211_v45, %v1207_v42  ;;  %v1256_v42 = vld [vmem:[%s3784_s12 + $0x388] sm:$0xff] }
 0x192   : > { %v1305_v53 = vpack.c.bf16 %v1213_v49, %v1209_v46  ;;  %v1260_v45 = vld [vmem:[%s3784_s12 + $0x3a8] sm:$0xff]  ;;  %v1258_v46 = vld [vmem:[%s3784_s12 + $0x398] sm:$0xff] }
 0x193   : > { %v1262_v49 = vld [vmem:[%s3784_s12 + $0x3b8] sm:$0xff]  ;;  %v1328_v21 = vpack.c.bf16 %v1260_v45, %v1256_v42 }
 0x194   : > { %v1330_v60 = vpack.c.bf16 %v1262_v49, %v1258_v46 }
 0x197   : > { %1428 = vmatmul.mubr.bf16.gmra.mrb[12].mxu0 %v1283_v47  ;;  %v1215_v47 = vld [vmem:[%s3784_s12 + $0x240] sm:$0xff] }
 0x198   : > { %1589 = vmatmul.mubr.bf16.gmra.mrb[12].mxu1 %v1285_v24  ;;  %1435 = vmatprep.mubr.bf16.mxu0 %v1288_v18  ;;  %v1219_v24 = vld [vmem:[%s3784_s12 + $0x260] sm:$0xff]  ;;  %v1217_v18 = vld [vmem:[%s3784_s12 + $0x250] sm:$0xff] }
 0x199   : > { %1596 = vmatprep.mubr.bf16.mxu1 %v1290_v56  ;;  %v1221_v56 = vld [vmem:[%s3784_s12 + $0x270] sm:$0xff]  ;;  %v1307_v51 = vpack.c.bf16 %v1219_v24, %v1215_v47  ;;  %v1264_v47 = vld [vmem:[%s3784_s12 + $0x3c8] sm:$0xff] }
 0x19a   : > { %v1309_v58 = vpack.c.bf16 %v1221_v56, %v1217_v18  ;;  %v1268_v24 = vld [vmem:[%s3784_s12 + $0x3e8] sm:$0xff]  ;;  %v1266_v18 = vld [vmem:[%s3784_s12 + $0x3d8] sm:$0xff] }
 0x19b   : > { %v1270_v56 = vld [vmem:[%s3784_s12 + $0x3f8] sm:$0xff]  ;;  %v1332_v29 = vpack.c.bf16 %v1268_v24, %v1264_v47 }
 0x19c   : > { %v1334_v57 = vpack.c.bf16 %v1270_v56, %v1266_v18 }
 0x19f   : > { %1436 = vmatmul.mubr.bf16.gmra.mrb[16].mxu0 %v1287_v12  ;;  %v1223_v12 = vld [vmem:[%s3784_s12 + $0x280] sm:$0xff] }
 0x1a0   : > { %1597 = vmatmul.mubr.bf16.gmra.mrb[16].mxu1 %v1289_v27  ;;  %1443 = vmatprep.mubr.bf16.mxu0 %v1292_v62  ;;  %v1227_v27 = vld [vmem:[%s3784_s12 + $0x2a0] sm:$0xff]  ;;  %v1225_v62 = vld [vmem:[%s3784_s12 + $0x290] sm:$0xff] }
 0x1a1   : > { %1604 = vmatprep.mubr.bf16.mxu1 %v1294_v30  ;;  %v1229_v30 = vld [vmem:[%s3784_s12 + $0x2b0] sm:$0xff]  ;;  %v1311_v3 = vpack.c.bf16 %v1227_v27, %v1223_v12 }
 0x1a2   : > { %v1313_v6 = vpack.c.bf16 %v1229_v30, %v1225_v62 }
 0x1a7   : > { %1444 = vmatmul.mubr.bf16.gmra.mrb[20].mxu0 %v1291_v37  ;;  %v1231_v37 = vld [vmem:[%s3784_s12 + $0x2c0] sm:$0xff] }
 0x1a8   : > { %1605 = vmatmul.mubr.bf16.gmra.mrb[20].mxu1 %v1293_v15  ;;  %1451 = vmatprep.mubr.bf16.mxu0 %v1296_v61  ;;  %v1235_v15 = vld [vmem:[%s3784_s12 + $0x2e0] sm:$0xff]  ;;  %v1233_v61 = vld [vmem:[%s3784_s12 + $0x2d0] sm:$0xff] }
 0x1a9   : > { %1612 = vmatprep.mubr.bf16.mxu1 %v1298_v34  ;;  %v1237_v34 = vld [vmem:[%s3784_s12 + $0x2f0] sm:$0xff]  ;;  %v1315_v17 = vpack.c.bf16 %v1235_v15, %v1231_v37 }
 0x1aa   : > { %v1317_v35 = vpack.c.bf16 %v1237_v34, %v1233_v61 }
 0x1af   : > { %1452 = vmatmul.mubr.bf16.gmra.mrb[24].mxu0 %v1295_v5  ;;  %v1239_v5 = vld [vmem:[%s3784_s12 + $0x300] sm:$0xff] }
 0x1b0   : > { %1613 = vmatmul.mubr.bf16.gmra.mrb[24].mxu1 %v1297_v23  ;;  %1459 = vmatprep.mubr.bf16.mxu0 %v1300_v25  ;;  %v1243_v23 = vld [vmem:[%s3784_s12 + $0x320] sm:$0xff]  ;;  %v1241_v25 = vld [vmem:[%s3784_s12 + $0x310] sm:$0xff] }
 0x1b1   : > { %1620 = vmatprep.mubr.bf16.mxu1 %v1302_v48  ;;  %v1245_v48 = vld [vmem:[%s3784_s12 + $0x330] sm:$0xff]  ;;  %v1319_v43 = vpack.c.bf16 %v1243_v23, %v1239_v5 }
 0x1b2   : > { %v1321_v10 = vpack.c.bf16 %v1245_v48, %v1241_v25 }
 0x1b7   : > { %1460 = vmatmul.mubr.bf16.gmra.mrb[28].mxu0 %v1299_v4  ;;  %v1247_v4 = vld [vmem:[%s3784_s12 + $0x340] sm:$0xff] }
 0x1b8   : > { %1621 = vmatmul.mubr.bf16.gmra.mrb[28].mxu1 %v1301_v20  ;;  %1467 = vmatprep.mubr.bf16.mxu0 %v1304_v44  ;;  %v1251_v20 = vld [vmem:[%s3784_s12 + $0x360] sm:$0xff]  ;;  %v1249_v44 = vld [vmem:[%s3784_s12 + $0x350] sm:$0xff] }
 0x1b9   : > { %1628 = vmatprep.mubr.bf16.mxu1 %v1306_v41  ;;  %v1253_v41 = vld [vmem:[%s3784_s12 + $0x370] sm:$0xff]  ;;  %v1323_v50 = vpack.c.bf16 %v1251_v20, %v1247_v4 }
 0x1ba   : > { %v1325_v55 = vpack.c.bf16 %v1253_v41, %v1249_v44 }
 0x1bf   : > { %1468 = vmatmul.mubr.bf16.gmra.mrb[32].mxu0 %v1303_v52  ;;  %v1255_v52 = vld [vmem:[%s3784_s12 + $0x380] sm:$0xff] }
 0x1c0   : > { %1629 = vmatmul.mubr.bf16.gmra.mrb[32].mxu1 %v1305_v53  ;;  %1475 = vmatprep.mubr.bf16.mxu0 %v1308_v26  ;;  %v1259_v53 = vld [vmem:[%s3784_s12 + $0x3a0] sm:$0xff]  ;;  %v1257_v26 = vld [vmem:[%s3784_s12 + $0x390] sm:$0xff] }
 0x1c1   : > { %1636 = vmatprep.mubr.bf16.mxu1 %v1310_v28  ;;  %v1261_v28 = vld [vmem:[%s3784_s12 + $0x3b0] sm:$0xff]  ;;  %v1327_v59 = vpack.c.bf16 %v1259_v53, %v1255_v52 }
 0x1c2   : > { %v1329_v11 = vpack.c.bf16 %v1261_v28, %v1257_v26 }
 0x1c7   : > { %1476 = vmatmul.mubr.bf16.gmra.mrb[36].mxu0 %v1307_v51  ;;  %v1263_v51 = vld [vmem:[%s3784_s12 + $0x3c0] sm:$0xff] }
 0x1c8   : > { %1637 = vmatmul.mubr.bf16.gmra.mrb[36].mxu1 %v1309_v58  ;;  %1483 = vmatprep.mubr.bf16.mxu0 %v1312_v36  ;;  %v1267_v58 = vld [vmem:[%s3784_s12 + $0x3e0] sm:$0xff]  ;;  %v1265_v36 = vld [vmem:[%s3784_s12 + $0x3d0] sm:$0xff] }
 0x1c9   : > { %1644 = vmatprep.mubr.bf16.mxu1 %v1314_v0  ;;  %v1269_v0 = vld [vmem:[%s3784_s12 + $0x3f0] sm:$0xff]  ;;  %v1331_v12 = vpack.c.bf16 %v1267_v58, %v1263_v51  ;;  %s4270_s12 = scalar_lea.vmem [#allocation3], %s2942_s21 }
 0x1ca   : > { %v1333_v27 = vpack.c.bf16 %v1269_v0, %v1265_v36 }
 0x1cf   : > { %1484 = vmatmul.mubr.bf16.gmra.mrb[40].mxu0 %v1311_v3 }
 0x1d0   : > { %1645 = vmatmul.mubr.bf16.gmra.mrb[40].mxu1 %v1313_v6  ;;  %1491 = vmatprep.mubr.bf16.mxu0 %v1316_v8 }
 0x1d1   : > { %1652 = vmatprep.mubr.bf16.mxu1 %v1318_v9 }
 0x1d7   : > { %1492 = vmatmul.mubr.bf16.gmra.mrb[44].mxu0 %v1315_v17 }
 0x1d8   : > { %1653 = vmatmul.mubr.bf16.gmra.mrb[44].mxu1 %v1317_v35  ;;  %1499 = vmatprep.mubr.bf16.mxu0 %v1320_v19 }
 0x1d9   : > { %1660 = vmatprep.mubr.bf16.mxu1 %v1322_v22 }
 0x1df   : > { %1500 = vmatmul.mubr.bf16.gmra.mrb[48].mxu0 %v1319_v43 }
 0x1e0   : > { %1661 = vmatmul.mubr.bf16.gmra.mrb[48].mxu1 %v1321_v10  ;;  %1507 = vmatprep.mubr.bf16.mxu0 %v1324_v40 }
 0x1e1   : > { %1668 = vmatprep.mubr.bf16.mxu1 %v1326_v13 }
 0x1e7   : > { %1508 = vmatmul.mubr.bf16.gmra.mrb[52].mxu0 %v1323_v50 }
 0x1e8   : > { %1669 = vmatmul.mubr.bf16.gmra.mrb[52].mxu1 %v1325_v55  ;;  %1515 = vmatprep.mubr.bf16.mxu0 %v1328_v21 }
 0x1e9   : > { %1676 = vmatprep.mubr.bf16.mxu1 %v1330_v60 }
 0x1ef   : > { %1516 = vmatmul.mubr.bf16.gmra.mrb[56].mxu0 %v1327_v59 }
 0x1f0   : > { %1677 = vmatmul.mubr.bf16.gmra.mrb[56].mxu1 %v1329_v11  ;;  %1523 = vmatprep.mubr.bf16.mxu0 %v1332_v29 }
 0x1f1   : > { %1684 = vmatprep.mubr.bf16.mxu1 %v1334_v57 }
 0x1f7   : > { %1524 = vmatmul.mubr.bf16.gmra.mrb[60].mxu0 %v1331_v12 }
 0x1f8   : > { %1685 = vmatmul.mubr.bf16.gmra.mrb[60].mxu1 %v1333_v27 }
 0x252   : > { %v3027_v62 = vpop.f32.mrb[0].mxu0 }
 0x253   : > { %v3139_v30 = vpop.f32.mrb[0].mxu1  ;;  %v3028_v1 = vpop.f32.mrb[1].mxu0 }
 0x254   : > { %v3140_v54 = vpop.f32.mrb[1].mxu1  ;;  %v3029_v63 = vadd.f32 %v3028_v1, %v3027_v62  ;;  %v3030_v3 = vpop.f32.mrb[2].mxu0 }
 0x255   : > { %v3141_v2 = vadd.f32 %v3140_v54, %v3139_v30  ;;  %v3142_v6 = vpop.f32.mrb[2].mxu1  ;;  %v3031_v8 = vpop.f32.mrb[3].mxu0 }
 0x256   : > { %v3143_v9 = vpop.f32.mrb[3].mxu1  ;;  %v3032_v15 = vadd.f32 %v3031_v8, %v3030_v3 }
 0x257   : > { %v1567_v37 = vadd.f32 %v3141_v2, %v3029_v63  ;;  %v3144_v61 = vadd.f32 %v3143_v9, %v3142_v6 }
 0x259   : > { %v1570_v34 = vadd.f32 %v3144_v61, %v3032_v15  ;;  %v1869_v31 = vmul.f32 %v1567_v37, %v1567_v37 }
 0x25a   : > { %v3033_v17 = vpop.f32.mrb[4].mxu0 }
 0x25b   : > { %v1792_v7 = vpack.c.bf16 %v1570_v34, %v1567_v37  ;;  %v1829_v16 = vadd.f32 %v1570_v34, %v1567_v37  ;;  %v1870_v32 = vmul.f32 %v1570_v34, %v1570_v34  ;;  %v3145_v35 = vpop.f32.mrb[4].mxu1  ;;  %v3034_v19 = vpop.f32.mrb[5].mxu0 }
 0x25c   : > { %v3146_v22 = vpop.f32.mrb[5].mxu1  ;;  %v3035_v23 = vadd.f32 %v3034_v19, %v3033_v17  ;;  %v3036_v48 = vpop.f32.mrb[6].mxu0 }
 0x25d   : > { %1812 = vst [vmem:[%s4270_s12] sm:$0xff] %v1792_v7  ;;  %v1901_v5 = vadd.f32 %v1870_v32, %v1869_v31  ;;  %v3147_v25 = vadd.f32 %v3146_v22, %v3145_v35  ;;  %v3148_v14 = vpop.f32.mrb[6].mxu1  ;;  %v3037_v33 = vpop.f32.mrb[7].mxu0 }
 0x25e   : > { %v3149_v38 = vpop.f32.mrb[7].mxu1  ;;  %v3038_v43 = vadd.f32 %v3037_v33, %v3036_v48 }
 0x25f   : > { %v1575_v39 = vadd.f32 %v3147_v25, %v3035_v23  ;;  %v3150_v10 = vadd.f32 %v3149_v38, %v3148_v14 }
 0x261   : > { %v1830_v40 = vadd.f32 %v1829_v16, %v1575_v39  ;;  %v1871_v13 = vmul.f32 %v1575_v39, %v1575_v39  ;;  %v1578_v4 = vadd.f32 %v3150_v10, %v3038_v43 }
 0x262   : > { %v3039_v45 = vpop.f32.mrb[8].mxu0 }
 0x263   : > { %v1902_v20 = vadd.f32 %v1901_v5, %v1871_v13  ;;  %v1793_v44 = vpack.c.bf16 %v1578_v4, %v1575_v39  ;;  %v1831_v41 = vadd.f32 %v1830_v40, %v1578_v4  ;;  %v1872_v42 = vmul.f32 %v1578_v4, %v1578_v4  ;;  %v3151_v46 = vpop.f32.mrb[8].mxu1  ;;  %v3040_v49 = vpop.f32.mrb[9].mxu0 }
 0x264   : > { %v3152_v50 = vpop.f32.mrb[9].mxu1  ;;  %v3041_v21 = vadd.f32 %v3040_v49, %v3039_v45  ;;  %v3042_v52 = vpop.f32.mrb[10].mxu0 }
 0x265   : > { %1813 = vst [vmem:[%s4270_s12 + $0x8] sm:$0xff] %v1793_v44  ;;  %v1903_v55 = vadd.f32 %v1902_v20, %v1872_v42  ;;  %v3153_v60 = vadd.f32 %v3152_v50, %v3151_v46  ;;  %v3154_v53 = vpop.f32.mrb[10].mxu1  ;;  %v3043_v26 = vpop.f32.mrb[11].mxu0 }
 0x266   : > { %v3155_v28 = vpop.f32.mrb[11].mxu1  ;;  %v3044_v24 = vadd.f32 %v3043_v26, %v3042_v52 }
 0x267   : > { %v1583_v47 = vadd.f32 %v3153_v60, %v3041_v21  ;;  %v3156_v18 = vadd.f32 %v3155_v28, %v3154_v53 }
 0x269   : > { %v1832_v56 = vadd.f32 %v1831_v41, %v1583_v47  ;;  %v1873_v59 = vmul.f32 %v1583_v47, %v1583_v47  ;;  %v1586_v11 = vadd.f32 %v3156_v18, %v3044_v24 }
 0x26a   : > { %v3045_v36 = vpop.f32.mrb[12].mxu0 }
 0x26b   : > { %v1904_v29 = vadd.f32 %v1903_v55, %v1873_v59  ;;  %v1794_v57 = vpack.c.bf16 %v1586_v11, %v1583_v47  ;;  %v1833_v51 = vadd.f32 %v1832_v56, %v1586_v11  ;;  %v1874_v58 = vmul.f32 %v1586_v11, %v1586_v11  ;;  %v3157_v0 = vpop.f32.mrb[12].mxu1  ;;  %v3046_v12 = vpop.f32.mrb[13].mxu0 }
 0x26c   : > { %v3158_v27 = vpop.f32.mrb[13].mxu1  ;;  %v3047_v30 = vadd.f32 %v3046_v12, %v3045_v36  ;;  %v3048_v54 = vpop.f32.mrb[14].mxu0 }
 0x26d   : > { %1814 = vst [vmem:[%s4270_s12 + $0x10] sm:$0xff] %v1794_v57  ;;  %v1905_v62 = vadd.f32 %v1904_v29, %v1874_v58  ;;  %v3159_v1 = vadd.f32 %v3158_v27, %v3157_v0  ;;  %v3160_v63 = vpop.f32.mrb[14].mxu1  ;;  %v3049_v2 = vpop.f32.mrb[15].mxu0 }
 0x26e   : > { %v3161_v3 = vpop.f32.mrb[15].mxu1  ;;  %v3050_v8 = vadd.f32 %v3049_v2, %v3048_v54 }
 0x26f   : > { %v1591_v6 = vadd.f32 %v3159_v1, %v3047_v30  ;;  %v3162_v9 = vadd.f32 %v3161_v3, %v3160_v63 }
 0x271   : > { %v1834_v37 = vadd.f32 %v1833_v51, %v1591_v6  ;;  %v1875_v15 = vmul.f32 %v1591_v6, %v1591_v6  ;;  %v1594_v61 = vadd.f32 %v3162_v9, %v3050_v8 }
 0x272   : > { %v3051_v32 = vpop.f32.mrb[16].mxu0 }
 0x273   : > { %v1906_v34 = vadd.f32 %v1905_v62, %v1875_v15  ;;  %v1795_v31 = vpack.c.bf16 %v1594_v61, %v1591_v6  ;;  %v1835_v7 = vadd.f32 %v1834_v37, %v1594_v61  ;;  %v1876_v16 = vmul.f32 %v1594_v61, %v1594_v61  ;;  %v3163_v17 = vpop.f32.mrb[16].mxu1  ;;  %v3052_v35 = vpop.f32.mrb[17].mxu0 }
 0x274   : > { %v3164_v19 = vpop.f32.mrb[17].mxu1  ;;  %v3053_v5 = vadd.f32 %v3052_v35, %v3051_v32  ;;  %v3054_v25 = vpop.f32.mrb[18].mxu0 }
 0x275   : > { %1815 = vst [vmem:[%s4270_s12 + $0x18] sm:$0xff] %v1795_v31  ;;  %v1907_v22 = vadd.f32 %v1906_v34, %v1876_v16  ;;  %v3165_v23 = vadd.f32 %v3164_v19, %v3163_v17  ;;  %v3166_v48 = vpop.f32.mrb[18].mxu1  ;;  %v3055_v14 = vpop.f32.mrb[19].mxu0 }
 0x276   : > { %v3167_v33 = vpop.f32.mrb[19].mxu1  ;;  %v3056_v39 = vadd.f32 %v3055_v14, %v3054_v25 }
 0x277   : > { %v1599_v38 = vadd.f32 %v3165_v23, %v3053_v5  ;;  %v3168_v43 = vadd.f32 %v3167_v33, %v3166_v48 }
 0x279   : > { %v1836_v10 = vadd.f32 %v1835_v7, %v1599_v38  ;;  %v1877_v40 = vmul.f32 %v1599_v38, %v1599_v38  ;;  %v1602_v13 = vadd.f32 %v3168_v43, %v3056_v39 }
 0x27a   : > { %v3057_v42 = vpop.f32.mrb[20].mxu0 }
 0x27b   : > { %v1908_v4 = vadd.f32 %v1907_v22, %v1877_v40  ;;  %v1796_v20 = vpack.c.bf16 %v1602_v13, %v1599_v38  ;;  %v1837_v44 = vadd.f32 %v1836_v10, %v1602_v13  ;;  %v1878_v41 = vmul.f32 %v1602_v13, %v1602_v13  ;;  %v3169_v45 = vpop.f32.mrb[20].mxu1  ;;  %v3058_v46 = vpop.f32.mrb[21].mxu0 }
 0x27c   : > { %v3170_v49 = vpop.f32.mrb[21].mxu1  ;;  %v3059_v55 = vadd.f32 %v3058_v46, %v3057_v42  ;;  %v3060_v60 = vpop.f32.mrb[22].mxu0 }
 0x27d   : > { %1816 = vst [vmem:[%s4270_s12 + $0x20] sm:$0xff] %v1796_v20  ;;  %v1909_v50 = vadd.f32 %v1908_v4, %v1878_v41  ;;  %v3171_v21 = vadd.f32 %v3170_v49, %v3169_v45  ;;  %v3172_v52 = vpop.f32.mrb[22].mxu1  ;;  %v3061_v53 = vpop.f32.mrb[23].mxu0 }
 0x27e   : > { %v3173_v26 = vpop.f32.mrb[23].mxu1  ;;  %v3062_v47 = vadd.f32 %v3061_v53, %v3060_v60 }
 0x27f   : > { %v1607_v28 = vadd.f32 %v3171_v21, %v3059_v55  ;;  %v3174_v24 = vadd.f32 %v3173_v26, %v3172_v52 }
 0x281   : > { %v1838_v18 = vadd.f32 %v1837_v44, %v1607_v28  ;;  %v1879_v56 = vmul.f32 %v1607_v28, %v1607_v28  ;;  %v1610_v59 = vadd.f32 %v3174_v24, %v3062_v47 }
 0x282   : > { %v3063_v58 = vpop.f32.mrb[24].mxu0 }
 0x283   : > { %v1910_v11 = vadd.f32 %v1909_v50, %v1879_v56  ;;  %v1797_v29 = vpack.c.bf16 %v1610_v59, %v1607_v28  ;;  %v1839_v57 = vadd.f32 %v1838_v18, %v1610_v59  ;;  %v1880_v51 = vmul.f32 %v1610_v59, %v1610_v59  ;;  %v3175_v36 = vpop.f32.mrb[24].mxu1  ;;  %v3064_v0 = vpop.f32.mrb[25].mxu0 }
 0x284   : > { %v3176_v12 = vpop.f32.mrb[25].mxu1  ;;  %v3065_v62 = vadd.f32 %v3064_v0, %v3063_v58  ;;  %v3066_v1 = vpop.f32.mrb[26].mxu0 }
 0x285   : > { %1817 = vst [vmem:[%s4270_s12 + $0x28] sm:$0xff] %v1797_v29  ;;  %v1911_v27 = vadd.f32 %v1910_v11, %v1880_v51  ;;  %v3177_v30 = vadd.f32 %v3176_v12, %v3175_v36  ;;  %v3178_v54 = vpop.f32.mrb[26].mxu1  ;;  %v3067_v63 = vpop.f32.mrb[27].mxu0 }
 0x286   : > { %v3179_v2 = vpop.f32.mrb[27].mxu1  ;;  %v3068_v6 = vadd.f32 %v3067_v63, %v3066_v1 }
 0x287   : > { %v1615_v3 = vadd.f32 %v3177_v30, %v3065_v62  ;;  %v3180_v8 = vadd.f32 %v3179_v2, %v3178_v54 }
 0x289   : > { %v1840_v9 = vadd.f32 %v1839_v57, %v1615_v3  ;;  %v1881_v37 = vmul.f32 %v1615_v3, %v1615_v3  ;;  %v1618_v15 = vadd.f32 %v3180_v8, %v3068_v6 }
 0x28a   : > { %v3069_v16 = vpop.f32.mrb[28].mxu0 }
 0x28b   : > { %v1912_v61 = vadd.f32 %v1911_v27, %v1881_v37  ;;  %v1798_v34 = vpack.c.bf16 %v1618_v15, %v1615_v3  ;;  %v1841_v31 = vadd.f32 %v1840_v9, %v1618_v15  ;;  %v1882_v7 = vmul.f32 %v1618_v15, %v1618_v15  ;;  %v3181_v32 = vpop.f32.mrb[28].mxu1  ;;  %v3070_v17 = vpop.f32.mrb[29].mxu0 }
 0x28c   : > { %v3182_v35 = vpop.f32.mrb[29].mxu1  ;;  %v3071_v22 = vadd.f32 %v3070_v17, %v3069_v16  ;;  %v3072_v23 = vpop.f32.mrb[30].mxu0 }
 0x28d   : > { %1818 = vst [vmem:[%s4270_s12 + $0x30] sm:$0xff] %v1798_v34  ;;  %v1913_v19 = vadd.f32 %v1912_v61, %v1882_v7  ;;  %v3183_v5 = vadd.f32 %v3182_v35, %v3181_v32  ;;  %v3184_v25 = vpop.f32.mrb[30].mxu1  ;;  %v3073_v48 = vpop.f32.mrb[31].mxu0 }
 0x28e   : > { %v3185_v14 = vpop.f32.mrb[31].mxu1  ;;  %v3074_v38 = vadd.f32 %v3073_v48, %v3072_v23 }
 0x28f   : > { %v1623_v33 = vadd.f32 %v3183_v5, %v3071_v22  ;;  %v3186_v39 = vadd.f32 %v3185_v14, %v3184_v25 }
 0x291   : > { %v1842_v43 = vadd.f32 %v1841_v31, %v1623_v33  ;;  %v1883_v10 = vmul.f32 %v1623_v33, %v1623_v33  ;;  %v1626_v40 = vadd.f32 %v3186_v39, %v3074_v38 }
 0x292   : > { %v3075_v41 = vpop.f32.mrb[32].mxu0 }
 0x293   : > { %v1914_v13 = vadd.f32 %v1913_v19, %v1883_v10  ;;  %v1799_v4 = vpack.c.bf16 %v1626_v40, %v1623_v33  ;;  %v1843_v20 = vadd.f32 %v1842_v43, %v1626_v40  ;;  %v1884_v44 = vmul.f32 %v1626_v40, %v1626_v40  ;;  %v3187_v42 = vpop.f32.mrb[32].mxu1  ;;  %v3076_v45 = vpop.f32.mrb[33].mxu0 }
 0x294   : > { %v3188_v46 = vpop.f32.mrb[33].mxu1  ;;  %v3077_v50 = vadd.f32 %v3076_v45, %v3075_v41  ;;  %v3078_v21 = vpop.f32.mrb[34].mxu0 }
 0x295   : > { %1819 = vst [vmem:[%s4270_s12 + $0x38] sm:$0xff] %v1799_v4  ;;  %v1915_v49 = vadd.f32 %v1914_v13, %v1884_v44  ;;  %v3189_v55 = vadd.f32 %v3188_v46, %v3187_v42  ;;  %v3190_v60 = vpop.f32.mrb[34].mxu1  ;;  %v3079_v52 = vpop.f32.mrb[35].mxu0 }
 0x296   : > { %v3191_v53 = vpop.f32.mrb[35].mxu1  ;;  %v3080_v28 = vadd.f32 %v3079_v52, %v3078_v21 }
 0x297   : > { %v1631_v26 = vadd.f32 %v3189_v55, %v3077_v50  ;;  %v3192_v47 = vadd.f32 %v3191_v53, %v3190_v60 }
 0x299   : > { %v1844_v24 = vadd.f32 %v1843_v20, %v1631_v26  ;;  %v1885_v18 = vmul.f32 %v1631_v26, %v1631_v26  ;;  %v1634_v56 = vadd.f32 %v3192_v47, %v3080_v28 }
 0x29a   : > { %v3081_v51 = vpop.f32.mrb[36].mxu0 }
 0x29b   : > { %v1916_v59 = vadd.f32 %v1915_v49, %v1885_v18  ;;  %v1800_v11 = vpack.c.bf16 %v1634_v56, %v1631_v26  ;;  %v1845_v29 = vadd.f32 %v1844_v24, %v1634_v56  ;;  %v1886_v57 = vmul.f32 %v1634_v56, %v1634_v56  ;;  %v3193_v58 = vpop.f32.mrb[36].mxu1  ;;  %v3082_v36 = vpop.f32.mrb[37].mxu0 }
 0x29c   : > { %v3194_v0 = vpop.f32.mrb[37].mxu1  ;;  %v3083_v27 = vadd.f32 %v3082_v36, %v3081_v51  ;;  %v3084_v30 = vpop.f32.mrb[38].mxu0 }
 0x29d   : > { %1820 = vst [vmem:[%s4270_s12 + $0x40] sm:$0xff] %v1800_v11  ;;  %v1917_v12 = vadd.f32 %v1916_v59, %v1886_v57  ;;  %v3195_v62 = vadd.f32 %v3194_v0, %v3193_v58  ;;  %v3196_v1 = vpop.f32.mrb[38].mxu1  ;;  %v3085_v54 = vpop.f32.mrb[39].mxu0 }
 0x29e   : > { %v3197_v63 = vpop.f32.mrb[39].mxu1  ;;  %v3086_v3 = vadd.f32 %v3085_v54, %v3084_v30 }
 0x29f   : > { %v1639_v2 = vadd.f32 %v3195_v62, %v3083_v27  ;;  %v3198_v6 = vadd.f32 %v3197_v63, %v3196_v1 }
 0x2a1   : > { %v1846_v8 = vadd.f32 %v1845_v29, %v1639_v2  ;;  %v1887_v9 = vmul.f32 %v1639_v2, %v1639_v2  ;;  %v1642_v37 = vadd.f32 %v3198_v6, %v3086_v3 }
 0x2a2   : > { %v3087_v7 = vpop.f32.mrb[40].mxu0 }
 0x2a3   : > { %v1918_v15 = vadd.f32 %v1917_v12, %v1887_v9  ;;  %v1801_v61 = vpack.c.bf16 %v1642_v37, %v1639_v2  ;;  %v1847_v34 = vadd.f32 %v1846_v8, %v1642_v37  ;;  %v1888_v31 = vmul.f32 %v1642_v37, %v1642_v37  ;;  %v3199_v16 = vpop.f32.mrb[40].mxu1  ;;  %v3088_v32 = vpop.f32.mrb[41].mxu0 }
 0x2a4   : > { %v3200_v17 = vpop.f32.mrb[41].mxu1  ;;  %v3089_v19 = vadd.f32 %v3088_v32, %v3087_v7  ;;  %v3090_v5 = vpop.f32.mrb[42].mxu0 }
 0x2a5   : > { %1821 = vst [vmem:[%s4270_s12 + $0x48] sm:$0xff] %v1801_v61  ;;  %v1919_v35 = vadd.f32 %v1918_v15, %v1888_v31  ;;  %v3201_v22 = vadd.f32 %v3200_v17, %v3199_v16  ;;  %v3202_v23 = vpop.f32.mrb[42].mxu1  ;;  %v3091_v25 = vpop.f32.mrb[43].mxu0 }
 0x2a6   : > { %v3203_v48 = vpop.f32.mrb[43].mxu1  ;;  %v3092_v33 = vadd.f32 %v3091_v25, %v3090_v5 }
 0x2a7   : > { %v1647_v14 = vadd.f32 %v3201_v22, %v3089_v19  ;;  %v3204_v38 = vadd.f32 %v3203_v48, %v3202_v23 }
 0x2a9   : > { %v1848_v39 = vadd.f32 %v1847_v34, %v1647_v14  ;;  %v1889_v43 = vmul.f32 %v1647_v14, %v1647_v14  ;;  %v1650_v10 = vadd.f32 %v3204_v38, %v3092_v33 }
 0x2aa   : > { %v3093_v44 = vpop.f32.mrb[44].mxu0 }
 0x2ab   : > { %v1920_v40 = vadd.f32 %v1919_v35, %v1889_v43  ;;  %v1802_v13 = vpack.c.bf16 %v1650_v10, %v1647_v14  ;;  %v1849_v4 = vadd.f32 %v1848_v39, %v1650_v10  ;;  %v1890_v20 = vmul.f32 %v1650_v10, %v1650_v10  ;;  %v3205_v41 = vpop.f32.mrb[44].mxu1  ;;  %v3094_v42 = vpop.f32.mrb[45].mxu0 }
 0x2ac   : > { %v3206_v45 = vpop.f32.mrb[45].mxu1  ;;  %v3095_v49 = vadd.f32 %v3094_v42, %v3093_v44  ;;  %v3096_v55 = vpop.f32.mrb[46].mxu0 }
 0x2ad   : > { %1822 = vst [vmem:[%s4270_s12 + $0x50] sm:$0xff] %v1802_v13  ;;  %v1921_v46 = vadd.f32 %v1920_v40, %v1890_v20  ;;  %v3207_v50 = vadd.f32 %v3206_v45, %v3205_v41  ;;  %v3208_v21 = vpop.f32.mrb[46].mxu1  ;;  %v3097_v60 = vpop.f32.mrb[47].mxu0 }
 0x2ae   : > { %v3209_v52 = vpop.f32.mrb[47].mxu1  ;;  %v3098_v26 = vadd.f32 %v3097_v60, %v3096_v55 }
 0x2af   : > { %v1655_v53 = vadd.f32 %v3207_v50, %v3095_v49  ;;  %v3210_v28 = vadd.f32 %v3209_v52, %v3208_v21 }
 0x2b1   : > { %v1850_v47 = vadd.f32 %v1849_v4, %v1655_v53  ;;  %v1891_v24 = vmul.f32 %v1655_v53, %v1655_v53  ;;  %v1658_v18 = vadd.f32 %v3210_v28, %v3098_v26 }
 0x2b2   : > { %v3099_v57 = vpop.f32.mrb[48].mxu0 }
 0x2b3   : > { %v1922_v56 = vadd.f32 %v1921_v46, %v1891_v24  ;;  %v1803_v59 = vpack.c.bf16 %v1658_v18, %v1655_v53  ;;  %v1851_v11 = vadd.f32 %v1850_v47, %v1658_v18  ;;  %v1892_v29 = vmul.f32 %v1658_v18, %v1658_v18  ;;  %v3211_v51 = vpop.f32.mrb[48].mxu1  ;;  %v3100_v58 = vpop.f32.mrb[49].mxu0 }
 0x2b4   : > { %v3212_v36 = vpop.f32.mrb[49].mxu1  ;;  %v3101_v12 = vadd.f32 %v3100_v58, %v3099_v57  ;;  %v3102_v62 = vpop.f32.mrb[50].mxu0 }
 0x2b5   : > { %1823 = vst [vmem:[%s4270_s12 + $0x58] sm:$0xff] %v1803_v59  ;;  %v1923_v0 = vadd.f32 %v1922_v56, %v1892_v29  ;;  %v3213_v27 = vadd.f32 %v3212_v36, %v3211_v51  ;;  %v3214_v30 = vpop.f32.mrb[50].mxu1  ;;  %v3103_v1 = vpop.f32.mrb[51].mxu0 }
 0x2b6   : > { %v3215_v54 = vpop.f32.mrb[51].mxu1  ;;  %v3104_v2 = vadd.f32 %v3103_v1, %v3102_v62 }
 0x2b7   : > { %v1663_v63 = vadd.f32 %v3213_v27, %v3101_v12  ;;  %v3216_v3 = vadd.f32 %v3215_v54, %v3214_v30 }
 0x2b9   : > { %v1852_v6 = vadd.f32 %v1851_v11, %v1663_v63  ;;  %v1893_v8 = vmul.f32 %v1663_v63, %v1663_v63  ;;  %v1666_v9 = vadd.f32 %v3216_v3, %v3104_v2 }
 0x2ba   : > { %v3105_v31 = vpop.f32.mrb[52].mxu0 }
 0x2bb   : > { %v1924_v37 = vadd.f32 %v1923_v0, %v1893_v8  ;;  %v1804_v15 = vpack.c.bf16 %v1666_v9, %v1663_v63  ;;  %v1853_v61 = vadd.f32 %v1852_v6, %v1666_v9  ;;  %v1894_v34 = vmul.f32 %v1666_v9, %v1666_v9  ;;  %v3217_v7 = vpop.f32.mrb[52].mxu1  ;;  %v3106_v16 = vpop.f32.mrb[53].mxu0 }
 0x2bc   : > { %v3218_v32 = vpop.f32.mrb[53].mxu1  ;;  %v3107_v35 = vadd.f32 %v3106_v16, %v3105_v31  ;;  %v3108_v22 = vpop.f32.mrb[54].mxu0 }
 0x2bd   : > { %1824 = vst [vmem:[%s4270_s12 + $0x60] sm:$0xff] %v1804_v15  ;;  %v1925_v17 = vadd.f32 %v1924_v37, %v1894_v34  ;;  %v3219_v19 = vadd.f32 %v3218_v32, %v3217_v7  ;;  %v3220_v5 = vpop.f32.mrb[54].mxu1  ;;  %v3109_v23 = vpop.f32.mrb[55].mxu0 }
 0x2be   : > { %v3221_v25 = vpop.f32.mrb[55].mxu1  ;;  %v3110_v14 = vadd.f32 %v3109_v23, %v3108_v22  ;;  %v1828_v23 = vld [vmem:[#allocation5] sm:$0x1] }
 0x2bf   : > { %v1671_v48 = vadd.f32 %v3219_v19, %v3107_v35  ;;  %v3222_v33 = vadd.f32 %v3221_v25, %v3220_v5 }
 0x2c1   : > { %v1854_v38 = vadd.f32 %v1853_v61, %v1671_v48  ;;  %v1895_v39 = vmul.f32 %v1671_v48, %v1671_v48  ;;  %v1674_v43 = vadd.f32 %v3222_v33, %v3110_v14  ;;  %v1868_v14 = vld [vmem:[#allocation6] sm:$0x1] }
 0x2c2   : > { %v3111_v20 = vpop.f32.mrb[56].mxu0 }
 0x2c3   : > { %v1926_v10 = vadd.f32 %v1925_v17, %v1895_v39  ;;  %v1805_v40 = vpack.c.bf16 %v1674_v43, %v1671_v48  ;;  %v1855_v13 = vadd.f32 %v1854_v38, %v1674_v43  ;;  %v1896_v4 = vmul.f32 %v1674_v43, %v1674_v43  ;;  %v3223_v44 = vpop.f32.mrb[56].mxu1  ;;  %v3112_v41 = vpop.f32.mrb[57].mxu0 }
 0x2c4   : > { %v3224_v42 = vpop.f32.mrb[57].mxu1  ;;  %v3113_v46 = vadd.f32 %v3112_v41, %v3111_v20  ;;  %v3114_v50 = vpop.f32.mrb[58].mxu0 }
 0x2c5   : > { %1825 = vst [vmem:[%s4270_s12 + $0x68] sm:$0xff] %v1805_v40  ;;  %v1927_v45 = vadd.f32 %v1926_v10, %v1896_v4  ;;  %v3225_v49 = vadd.f32 %v3224_v42, %v3223_v44  ;;  %v3226_v55 = vpop.f32.mrb[58].mxu1  ;;  %v3115_v21 = vpop.f32.mrb[59].mxu0 }
 0x2c6   : > { %v3227_v60 = vpop.f32.mrb[59].mxu1  ;;  %v3116_v53 = vadd.f32 %v3115_v21, %v3114_v50 }
 0x2c7   : > { %v1679_v52 = vadd.f32 %v3225_v49, %v3113_v46  ;;  %v3228_v26 = vadd.f32 %v3227_v60, %v3226_v55 }
 0x2c9   : > { %v1856_v28 = vadd.f32 %v1855_v13, %v1679_v52  ;;  %v1897_v47 = vmul.f32 %v1679_v52, %v1679_v52  ;;  %v1682_v24 = vadd.f32 %v3228_v26, %v3116_v53 }
 0x2ca   : > { %v3117_v29 = vpop.f32.mrb[60].mxu0 }
 0x2cb   : > { %v1928_v18 = vadd.f32 %v1927_v45, %v1897_v47  ;;  %v1806_v56 = vpack.c.bf16 %v1682_v24, %v1679_v52  ;;  %v1857_v59 = vadd.f32 %v1856_v28, %v1682_v24  ;;  %v1898_v11 = vmul.f32 %v1682_v24, %v1682_v24  ;;  %v3229_v57 = vpop.f32.mrb[60].mxu1  ;;  %v3118_v51 = vpop.f32.mrb[61].mxu0 }
 0x2cc   : > { %v3230_v58 = vpop.f32.mrb[61].mxu1  ;;  %v3119_v0 = vadd.f32 %v3118_v51, %v3117_v29  ;;  %v3120_v27 = vpop.f32.mrb[62].mxu0 }
 0x2cd   : > { %1826 = vst [vmem:[%s4270_s12 + $0x70] sm:$0xff] %v1806_v56  ;;  %v1929_v36 = vadd.f32 %v1928_v18, %v1898_v11  ;;  %v3231_v12 = vadd.f32 %v3230_v58, %v3229_v57  ;;  %v3232_v62 = vpop.f32.mrb[62].mxu1  ;;  %v3121_v30 = vpop.f32.mrb[63].mxu0 }
 0x2ce   : > { %v3233_v1 = vpop.f32.mrb[63].mxu1  ;;  %v3122_v63 = vadd.f32 %v3121_v30, %v3120_v27 }
 0x2cf   : > { %v1687_v54 = vadd.f32 %v3231_v12, %v3119_v0  ;;  %v3234_v2 = vadd.f32 %v3233_v1, %v3232_v62 }
 0x2d1   : > { %v1858_v3 = vadd.f32 %v1857_v59, %v1687_v54  ;;  %v1899_v6 = vmul.f32 %v1687_v54, %v1687_v54  ;;  %v1690_v8 = vadd.f32 %v3234_v2, %v3122_v63 }
 0x2d3   : > { %v1930_v9 = vadd.f32 %v1929_v36, %v1899_v6  ;;  %v1807_v37 = vpack.c.bf16 %v1690_v8, %v1687_v54  ;;  %v1859_v15 = vadd.f32 %v1858_v3, %v1690_v8  ;;  %v1900_v61 = vmul.f32 %v1690_v8, %v1690_v8 }
 0x2d5   : > { %1827 = vst [vmem:[%s4270_s12 + $0x78] sm:$0xff] %v1807_v37  ;;  %v1860_v34 = vrot.slane %v1859_v15, 4  ;;  %v1931_v31 = vadd.f32 %v1930_v9, %v1900_v61 }
 0x2d7   : > { %v1861_v7 = vadd.f32 %v1860_v34, %v1859_v15  ;;  %v1932_v16 = vrot.slane %v1931_v31, 4 }
 0x2d9   : > { %v1862_v32 = vrot.slane %v1861_v7, 2  ;;  %v1933_v17 = vadd.f32 %v1932_v16, %v1931_v31 }
 0x2db   : > { %v1863_v35 = vadd.f32 %v1862_v32, %v1861_v7  ;;  %v1934_v19 = vrot.slane %v1933_v17, 2 }
 0x2dd   : > { %v1864_v22 = vrot.slane %v1863_v35, 1  ;;  %v1935_v5 = vadd.f32 %v1934_v19, %v1933_v17 }
 0x2df   : > { %v1865_v25 = vadd.f32 %v1864_v22, %v1863_v35  ;;  %v1936_v48 = vrot.slane %v1935_v5, 1 }
 0x2e1   : > { %v1866_v33 = vadd.f32 %v1865_v25, %v1828_v23  ;;  %v1937_v38 = vadd.f32 %v1936_v48, %v1935_v5 }
 0x2e3   : > { %1867 = vst [vmem:[#allocation5] sm:$0x1] %v1866_v33  ;;  %v1938_v39 = vadd.f32 %v1937_v38, %v1868_v14 }
 0x2e5   : > { %1939 = vst [vmem:[#allocation6] sm:$0x1] %v1938_v39 }
 0x2e6 PF: > { %1944 = sbr.rel (!%p458_p9) target bundleno = 1094 (0x446), region = 84  ;;  %p2944_p13 = scmp.ne.s32.totalorder (%p458_p9), %s3660_s13, 0 }
 0x2ed   : > { %1948 = sbr.rel (%p2944_p13) target bundleno = 784 (0x310), region = 88  ;;  %v1949_v43 = vld [vmem:[#allocation5] sm:$0x1] (!%p2944_p13)  ;;  %v1953_v13 = vld [vmem:[#allocation6] sm:$0x1] (!%p2944_p13) }
 0x2ee   : > { %v1951_v10 = vld [vmem:[%s4550_s6] sm:$0x1] (!%p2944_p13)  ;;  %v1950_v40 = vmul.f32 (!%p2944_p13), 0.0026041667, %v1949_v43  ;;  %v1954_v20 = vmul.f32 (!%p2944_p13), 0.0026041667, %v1953_v13 }
 0x2ef   : > { %v1961_v55 = vld [vmem:[%s4548_s4] sm:$0x1] (!%p2944_p13) }
 0x2f0   : > { %v1952_v4 = vmul.f32 (!%p2944_p13), %v1951_v10, %v1950_v40  ;;  %v1966_v52 = vld [vmem:[%s4549_s5] sm:$0x1] (!%p2944_p13) }
 0x2f2   : > { %v1955_v44 = vmul.f32 (!%p2944_p13), 2.0, %v1952_v4  ;;  %v1958_v42 = vmul.f32 (!%p2944_p13), %v1952_v4, %v1952_v4 }
 0x2f4   : > { %v1956_v41 = vmul.f32 %v1955_v44, %v1950_v40 }
 0x2f6   : > { %v1957_v45 = vsub.f32 %v1954_v20, %v1956_v41 }
 0x2f8   : > { %v1959_v46 = vadd.f32 %v1958_v42, %v1957_v45 }
 0x2fa   : > { %v1960_v49 = vmax.f32 %v1959_v46, 0.0 }
 0x2fc   : > { %v1962_v50 = vadd.f32 1e-05, %v1960_v49 }
 0x2fe   : > { %3604 = vrsqrt.f32 %v1962_v50 }
 0x308   : > { %v3605_v21 = vpop.eup %3604 }
 0x309   : > { %v1964_v60 = vmul.f32 %v3605_v21, %v1961_v55 }
 0x30b   : > { %1965 = vst [vmem:[#allocation7] sm:$0x1] %v1964_v60  ;;  %v1967_v53 = vmul.f32 %v1964_v60, %v1952_v4 }
 0x30d   : > { %v1968_v26 = vsub.f32 %v1966_v52, %v1967_v53 }
 0x30f   : > { %1969 = vst [vmem:[#allocation8] sm:$0x1] %v1968_v26 }
 0x310 PF: > { %v3606_v28 = vld [vmem:[%s4552_s8] sm:$0xff]   ;;  %v3608_v24 = vld [vmem:[%s4552_s8 + $0x8] sm:$0xff]   ;;  %v3610_v56 = vld [vmem:[%s4552_s8 + $0x10] sm:$0xff]   ;;  %s1970_s26 = sshra.s32 %s3770_s20, 4 }
 0x311   : > { %v3607_v47 = vld [vmem:[%s4551_s7] sm:$0xff]   ;;  %3331 = vmatprep.subr.bf16.mxu1 %v3606_v28  ;;  %v3609_v18 = vld [vmem:[%s4551_s7 + $0x8] sm:$0xff]   ;;  %v3611_v59 = vld [vmem:[%s4551_s7 + $0x10] sm:$0xff]   ;;  %s2945_s18 = sshll.u32 %s1970_s26, 3 }
 0x312   : > { %3379 = vmatprep.subr.bf16.mxu0 %v3607_v47  ;;  %3332 = vmatpush3.bf16.msra.mxu1 %v3606_v28  ;;  %v3612_v11 = vld [vmem:[%s4552_s8 + $0x18] sm:$0xff]   ;;  %v3614_v57 = vld [vmem:[%s4552_s8 + $0x20] sm:$0xff]   ;;  %v3616_v58 = vld [vmem:[%s4552_s8 + $0x28] sm:$0xff]   ;;  %s4338_s24 = scalar_lea.vmem [#allocation3], %s2945_s18 }
 0x313   : > { %3380 = vmatpush3.bf16.msra.mxu0 %v3607_v47  ;;  %3333 = vmatprep.subr.bf16.mxu1 %v3608_v24  ;;  %v3613_v29 = vld [vmem:[%s4551_s7 + $0x18] sm:$0xff]   ;;  %v3615_v51 = vld [vmem:[%s4551_s7 + $0x20] sm:$0xff]   ;;  %v3617_v0 = vld [vmem:[%s4551_s7 + $0x28] sm:$0xff]  }
 0x314   : > { %3381 = vmatprep.subr.bf16.mxu0 %v3609_v18  ;;  %v3622_v36 = vld [vmem:[%s3779_s28] sm:$0xff]   ;;  %v1975_v54 = vld [vmem:[%s4338_s24 + $0x8] sm:$0xff]  ;;  %v3618_v63 = vld [vmem:[%s4552_s8 + $0x30] sm:$0xff]  }
 0x315   : > { %v1974_v12 = vld [vmem:[%s4338_s24] sm:$0xff]  ;;  %3347 = vmatprep.mubr.bf16.mxu1 %v3622_v36  ;;  %v1992_v6 = vunpack.c.l.bf16 %v1975_v54  ;;  %v1993_v8 = vunpack.c.h.bf16 %v1975_v54  ;;  %v1976_v9 = vld [vmem:[%s4338_s24 + $0x10] sm:$0xff]  ;;  %v3620_v32 = vld [vmem:[%s4552_s8 + $0x38] sm:$0xff]  }
 0x316   : > { %3334 = vmatpush3.bf16.msra.mxu1 %v3608_v24  ;;  %v4341_v27 = vld [vmem:[#allocation7] ss:$0 sm:$0xff]  ;;  %v1990_v62 = vunpack.c.l.bf16 %v1974_v12  ;;  %v1991_v30 = vunpack.c.h.bf16 %v1974_v12  ;;  %v4343_v1 = vld [vmem:[#allocation8] ss:$0 sm:$0xff]  ;;  %v3619_v37 = vld [vmem:[%s4551_s7 + $0x30] sm:$0xff]   ;;  %v1994_v15 = vunpack.c.l.bf16 %v1976_v9  ;;  %v1995_v61 = vunpack.c.h.bf16 %v1976_v9 }
 0x317   : > { %3382 = vmatpush3.bf16.msra.mxu0 %v3609_v18  ;;  %3335 = vmatprep.subr.bf16.mxu1 %v3610_v56  ;;  %v2031_v7 = vmul.f32 %v4341_v27, %v1992_v6  ;;  %v2032_v16 = vmul.f32 %v4341_v27, %v1993_v8  ;;  %v1977_v22 = vld [vmem:[%s4338_s24 + $0x18] sm:$0xff]  ;;  %v1978_v23 = vld [vmem:[%s4338_s24 + $0x20] sm:$0xff]  ;;  %v3623_v40 = vld [vmem:[%s3779_s28 + $0x8] sm:$0xff]  }
 0x318   : > { %3383 = vmatprep.subr.bf16.mxu0 %v3611_v59  ;;  %v2029_v2 = vmul.f32 %v4341_v27, %v1990_v62  ;;  %v2030_v3 = vmul.f32 %v4341_v27, %v1991_v30  ;;  %v2033_v35 = vmul.f32 %v4341_v27, %v1994_v15  ;;  %v2034_v19 = vmul.f32 %v4341_v27, %v1995_v61  ;;  %v3621_v5 = vld [vmem:[%s4551_s7 + $0x38] sm:$0xff]   ;;  %v3624_v13 = vld [vmem:[%s3779_s28 + $0x10] sm:$0xff]   ;;  %v1979_v41 = vld [vmem:[%s4338_s24 + $0x28] sm:$0xff] }
 0x319   : > { %v2070_v25 = vadd.f32 %v4343_v1, %v2031_v7  ;;  %v2071_v48 = vadd.f32 %v4343_v1, %v2032_v16  ;;  %v1996_v14 = vunpack.c.l.bf16 %v1977_v22  ;;  %v1997_v33 = vunpack.c.h.bf16 %v1977_v22  ;;  %v1980_v49 = vld [vmem:[%s4338_s24 + $0x30] sm:$0xff]  ;;  %v3625_v47 = vld [vmem:[%s3779_s28 + $0x18] sm:$0xff]  }
 0x31a   : > { %3336 = vmatpush3.bf16.msra.mxu1 %v3610_v56  ;;  %v2068_v34 = vadd.f32 %v4343_v1, %v2029_v2  ;;  %v2069_v31 = vadd.f32 %v4343_v1, %v2030_v3  ;;  %v2072_v38 = vadd.f32 %v4343_v1, %v2033_v35  ;;  %v2073_v39 = vadd.f32 %v4343_v1, %v2034_v19  ;;  %v3626_v56 = vld [vmem:[%s3779_s28 + $0x20] sm:$0xff]   ;;  %v1989_v36 = vld [vmem:[%s4338_s24 + $0x78] sm:$0xff]  ;;  %v1983_v19 = vld [vmem:[%s4338_s24 + $0x48] sm:$0xff] }
 0x31b   : > { %3384 = vmatpush3.bf16.msra.mxu0 %v3611_v59  ;;  %3337 = vmatprep.subr.bf16.mxu1 %v3612_v11  ;;  %v1998_v43 = vunpack.c.l.bf16 %v1978_v23  ;;  %v1999_v10 = vunpack.c.h.bf16 %v1978_v23  ;;  %v2101_v4 = vpack.c.bf16 %v2071_v48, %v2070_v25  ;;  %v2035_v20 = vmul.f32 %v4341_v27, %v1996_v14 }
 0x31c   : > { %3385 = vmatprep.subr.bf16.mxu0 %v3613_v29  ;;  %v2100_v17 = vpack.c.bf16 %v2069_v31, %v2068_v34  ;;  %v2036_v44 = vmul.f32 %v4341_v27, %v1997_v33  ;;  %v2102_v42 = vpack.c.bf16 %v2073_v39, %v2072_v38  ;;  %v2000_v50 = vunpack.c.l.bf16 %v1979_v41  ;;  %v3628_v34 = vld [vmem:[%s3779_s28 + $0x30] sm:$0xff]  }
 0x31d   : > { %v2037_v45 = vmul.f32 %v4341_v27, %v1998_v43  ;;  %v2038_v46 = vmul.f32 %v4341_v27, %v1999_v10  ;;  %v2074_v55 = vadd.f32 %v4343_v1, %v2035_v20  ;;  %v2001_v60 = vunpack.c.h.bf16 %v1979_v41 }
 0x31e   : > { %3338 = vmatpush3.bf16.msra.mxu1 %v3612_v11  ;;  %3395 = vmatprep.mubr.bf16.mxu0 %v2100_v17  ;;  %v2075_v21 = vadd.f32 %v4343_v1, %v2036_v44  ;;  %v2002_v26 = vunpack.c.l.bf16 %v1980_v49  ;;  %v2003_v28 = vunpack.c.h.bf16 %v1980_v49  ;;  %v2039_v24 = vmul.f32 %v4341_v27, %v2000_v50  ;;  %v1981_v11 = vld [vmem:[%s4338_s24 + $0x38] sm:$0xff]  ;;  %v1986_v49 = vld [vmem:[%s4338_s24 + $0x60] sm:$0xff] }
 0x31f   : > { %3386 = vmatpush3.bf16.msra.mxu0 %v3613_v29  ;;  %3339 = vmatprep.subr.bf16.mxu1 %v3614_v57  ;;  %v2076_v52 = vadd.f32 %v4343_v1, %v2037_v45  ;;  %v2077_v53 = vadd.f32 %v4343_v1, %v2038_v46  ;;  %v2040_v59 = vmul.f32 %v4341_v27, %v2001_v60  ;;  %v2004_v12 = vunpack.c.l.bf16 %v1981_v11  ;;  %v1985_v46 = vld [vmem:[%s4338_s24 + $0x58] sm:$0xff] }
 0x320   : > { %3387 = vmatprep.subr.bf16.mxu0 %v3615_v51  ;;  %v2103_v18 = vpack.c.bf16 %v2075_v21, %v2074_v55  ;;  %v2005_v30 = vunpack.c.h.bf16 %v1981_v11  ;;  %v2021_v8 = vunpack.c.h.bf16 %v1989_v36  ;;  %v2008_v14 = vunpack.c.l.bf16 %v1983_v19 }
 0x321   : > { %v2104_v29 = vpack.c.bf16 %v2077_v53, %v2076_v52  ;;  %v2079_v62 = vadd.f32 %v4343_v1, %v2040_v59  ;;  %v2043_v31 = vmul.f32 %v4341_v27, %v2004_v12  ;;  %v2009_v33 = vunpack.c.h.bf16 %v1983_v19 }
 0x322   : > { %3340 = vmatpush3.bf16.msra.mxu1 %v3614_v57  ;;  %v2041_v57 = vmul.f32 %v4341_v27, %v2002_v26  ;;  %v2060_v15 = vmul.f32 %v4341_v27, %v2021_v8  ;;  %v2044_v7 = vmul.f32 %v4341_v27, %v2005_v30  ;;  %v2047_v20 = vmul.f32 %v4341_v27, %v2008_v14  ;;  %v3634_v8 = vld [vmem:[%s3779_s28 + $0x60] sm:$0xff]  }
 0x323   : > { %3388 = vmatpush3.bf16.msra.mxu0 %v3615_v51  ;;  %3341 = vmatprep.subr.bf16.mxu1 %v3616_v58  ;;  %v2042_v51 = vmul.f32 %v4341_v27, %v2003_v28  ;;  %v2082_v25 = vadd.f32 %v4343_v1, %v2043_v31  ;;  %v2048_v44 = vmul.f32 %v4341_v27, %v2009_v33  ;;  %v2012_v21 = vunpack.c.l.bf16 %v1985_v46 }
 0x324   : > { %3389 = vmatprep.subr.bf16.mxu0 %v3617_v0  ;;  %v2080_v2 = vadd.f32 %v4343_v1, %v2041_v57  ;;  %v4411_v22 = vadd.f32 %v4343_v1, %v2060_v15  ;;  %v2083_v48 = vadd.f32 %v4343_v1, %v2044_v7  ;;  %v2086_v50 = vadd.f32 %v4343_v1, %v2047_v20 }
 0x325   : > { %v2081_v3 = vadd.f32 %v4343_v1, %v2042_v51  ;;  %v2087_v55 = vadd.f32 %v4343_v1, %v2048_v44  ;;  %v2013_v60 = vunpack.c.h.bf16 %v1985_v46  ;;  %v2014_v26 = vunpack.c.l.bf16 %v1986_v49  ;;  %v1987_v51 = vld [vmem:[%s4338_s24 + $0x68] sm:$0xff] }
 0x326   : > { %3342 = vmatpush3.bf16.msra.mxu1 %v3616_v58  ;;  %v1982_v58 = vld [vmem:[%s4338_s24 + $0x40] sm:$0xff]  ;;  %v2015_v28 = vunpack.c.h.bf16 %v1986_v49  ;;  %v2016_v12 = vunpack.c.l.bf16 %v1987_v51 }
 0x327   : > { %3390 = vmatpush3.bf16.msra.mxu0 %v3617_v0  ;;  %3343 = vmatprep.subr.bf16.mxu1 %v3618_v63  ;;  %v2078_v0 = vadd.f32 %v4343_v1, %v2039_v24  ;;  %v2006_v54 = vunpack.c.l.bf16 %v1982_v58  ;;  %v2007_v6 = vunpack.c.h.bf16 %v1982_v58  ;;  %v2109_v24 = vpack.c.bf16 %v2087_v55, %v2086_v50  ;;  %v1988_v58 = vld [vmem:[%s4338_s24 + $0x70] sm:$0xff] }
 0x328   : > { %3391 = vmatprep.subr.bf16.mxu0 %v3619_v37  ;;  %v2052_v59 = vmul.f32 %v4341_v27, %v2013_v60  ;;  %v2054_v57 = vmul.f32 %v4341_v27, %v2015_v28 }
 0x329   : > { %v2105_v61 = vpack.c.bf16 %v2079_v62, %v2078_v0  ;;  %v2045_v17 = vmul.f32 %v4341_v27, %v2006_v54  ;;  %v2046_v35 = vmul.f32 %v4341_v27, %v2007_v6  ;;  %v2017_v62 = vunpack.c.h.bf16 %v1987_v51 }
 0x32a   : > { %3344 = vmatpush3.bf16.msra.mxu1 %v3618_v63  ;;  %v2020_v63 = vunpack.c.l.bf16 %v1989_v36  ;;  %v2091_v0 = vadd.f32 %v4343_v1, %v2052_v59  ;;  %v2093_v54 = vadd.f32 %v4343_v1, %v2054_v57 }
 0x32b   : > { %3392 = vmatpush3.bf16.msra.mxu0 %v3619_v37  ;;  %3345 = vmatprep.subr.bf16.mxu1 %v3620_v32  ;;  %v3627_v37 = vld [vmem:[%s3779_s28 + $0x28] sm:$0xff]   ;;  %v2084_v38 = vadd.f32 %v4343_v1, %v2045_v17  ;;  %v2085_v39 = vadd.f32 %v4343_v1, %v2046_v35 }
 0x32c   : > { %3393 = vmatprep.subr.bf16.mxu0 %v3621_v5  ;;  %v2059_v9 = vmul.f32 %v4341_v27, %v2020_v63  ;;  %v2018_v63 = vunpack.c.l.bf16 %v1988_v58  ;;  %v3635_v35 = vld [vmem:[%s3779_s28 + $0x68] sm:$0xff]  }
 0x32d   : > { %v2108_v41 = vpack.c.bf16 %v2085_v39, %v2084_v38 }
 0x32e   : > { %3346 = vmatpush3.bf16.msra.mxu1 %v3620_v32  ;;  %v4405_v16 = vadd.f32 %v4343_v1, %v2059_v9  ;;  %v2106_v32 = vpack.c.bf16 %v2081_v3, %v2080_v2  ;;  %v2019_v2 = vunpack.c.h.bf16 %v1988_v58  ;;  %v3633_v3 = vld [vmem:[%s3779_s28 + $0x58] sm:$0xff]   ;;  %v2055_v9 = vmul.f32 %v4341_v27, %v2016_v12 }
 0x32f   : > { %3394 = vmatpush3.bf16.msra.mxu0 %v3621_v5  ;;  %v1984_v5 = vld [vmem:[%s4338_s24 + $0x50] sm:$0xff] }
 0x330   : > { %v2115_v23 = vpack.c.bf16 %v4411_v22, %v4405_v16  ;;  %v2010_v43 = vunpack.c.l.bf16 %v1984_v5  ;;  %v2011_v10 = vunpack.c.h.bf16 %v1984_v5  ;;  %v2094_v31 = vadd.f32 %v4343_v1, %v2055_v9  ;;  %v3636_v5 = vld [vmem:[%s3779_s28 + $0x70] sm:$0xff]  }
 0x331   : > { %3348 = vmatmul.mubr.bf16.vlgmr.msra.gmra.mrb[0].mxu1 %v3623_v40  ;;  %v3629_v40 = vld [vmem:[%s3779_s28 + $0x38] sm:$0xff]  }
 0x332   : > { %3396 = vmatmul.mubr.bf16.vlgmr.msra.gmra.mrb[0].mxu0 %v2101_v4  ;;  %3351 = vmatprep.mubr.bf16.mxu1 %v3624_v13  ;;  %v2107_v13 = vpack.c.bf16 %v2083_v48, %v2082_v25  ;;  %v3630_v4 = vld [vmem:[%s3779_s28 + $0x40] sm:$0xff]   ;;  %v2050_v45 = vmul.f32 %v4341_v27, %v2011_v10 }
 0x333   : > { %3399 = vmatprep.mubr.bf16.mxu0 %v2102_v42  ;;  %v2049_v42 = vmul.f32 %v4341_v27, %v2010_v43 }
 0x334   : > { %v2089_v53 = vadd.f32 %v4343_v1, %v2050_v45 }
 0x335   : > { %v2088_v52 = vadd.f32 %v4343_v1, %v2049_v42 }
 0x337   : > { %v2110_v11 = vpack.c.bf16 %v2089_v53, %v2088_v52 }
 0x339   : > { %3352 = vmatmul.mubr.bf16.gmra.mrb[4].mxu1 %v3625_v47  ;;  %v3631_v47 = vld [vmem:[%s3779_s28 + $0x48] sm:$0xff]  }
 0x33a   : > { %3400 = vmatmul.mubr.bf16.gmra.mrb[4].mxu0 %v2103_v18  ;;  %3355 = vmatprep.mubr.bf16.mxu1 %v3626_v56  ;;  %v3632_v18 = vld [vmem:[%s3779_s28 + $0x50] sm:$0xff]   ;;  %v2051_v56 = vmul.f32 %v4341_v27, %v2012_v21 }
 0x33b   : > { %3403 = vmatprep.mubr.bf16.mxu0 %v2104_v29  ;;  %v2053_v29 = vmul.f32 %v4341_v27, %v2014_v26 }
 0x33c   : > { %v2090_v36 = vadd.f32 %v4343_v1, %v2051_v56 }
 0x33d   : > { %v2092_v30 = vadd.f32 %v4343_v1, %v2053_v29 }
 0x33e   : > { %v2111_v6 = vpack.c.bf16 %v2091_v0, %v2090_v36 }
 0x33f   : > { %v2112_v15 = vpack.c.bf16 %v2093_v54, %v2092_v30 }
 0x341   : > { %3356 = vmatmul.mubr.bf16.gmra.mrb[8].mxu1 %v3627_v37  ;;  %v2056_v37 = vmul.f32 %v4341_v27, %v2017_v62 }
 0x342   : > { %3404 = vmatmul.mubr.bf16.gmra.mrb[8].mxu0 %v2105_v61  ;;  %3359 = vmatprep.mubr.bf16.mxu1 %v3628_v34  ;;  %v2057_v61 = vmul.f32 %v4341_v27, %v2018_v63  ;;  %v2058_v34 = vmul.f32 %v4341_v27, %v2019_v2  ;;  %v3637_v27 = vld [vmem:[%s3779_s28 + $0x78] sm:$0xff]  }
 0x343   : > { %3407 = vmatprep.mubr.bf16.mxu0 %v2106_v32  ;;  %v2095_v7 = vadd.f32 %v4343_v1, %v2056_v37 }
 0x344   : > { %v2096_v32 = vadd.f32 %v4343_v1, %v2057_v61  ;;  %v2097_v17 = vadd.f32 %v4343_v1, %v2058_v34  ;;  %v4463_v1 = vld [vmem:[%s4553_s9] ss:$0 sm:$0xff] }
 0x345   : > { %v2113_v19 = vpack.c.bf16 %v2095_v7, %v2094_v31 }
 0x346   : > { %v2114_v25 = vpack.c.bf16 %v2097_v17, %v2096_v32 }
 0x349   : > { %3360 = vmatmul.mubr.bf16.gmra.mrb[12].mxu1 %v3629_v40 }
 0x34a   : > { %3408 = vmatmul.mubr.bf16.gmra.mrb[12].mxu0 %v2107_v13  ;;  %3363 = vmatprep.mubr.bf16.mxu1 %v3630_v4 }
 0x34b   : > { %3411 = vmatprep.mubr.bf16.mxu0 %v2108_v41 }
 0x351   : > { %3364 = vmatmul.mubr.bf16.gmra.mrb[16].mxu1 %v3631_v47 }
 0x352   : > { %3412 = vmatmul.mubr.bf16.gmra.mrb[16].mxu0 %v2109_v24  ;;  %3367 = vmatprep.mubr.bf16.mxu1 %v3632_v18 }
 0x353   : > { %3415 = vmatprep.mubr.bf16.mxu0 %v2110_v11 }
 0x359   : > { %3368 = vmatmul.mubr.bf16.gmra.mrb[20].mxu1 %v3633_v3 }
 0x35a   : > { %3416 = vmatmul.mubr.bf16.gmra.mrb[20].mxu0 %v2111_v6  ;;  %3371 = vmatprep.mubr.bf16.mxu1 %v3634_v8 }
 0x35b   : > { %3419 = vmatprep.mubr.bf16.mxu0 %v2112_v15 }
 0x361   : > { %3372 = vmatmul.mubr.bf16.gmra.mrb[24].mxu1 %v3635_v35 }
 0x362   : > { %3420 = vmatmul.mubr.bf16.gmra.mrb[24].mxu0 %v2113_v19  ;;  %3375 = vmatprep.mubr.bf16.mxu1 %v3636_v5 }
 0x363   : > { %3423 = vmatprep.mubr.bf16.mxu0 %v2114_v25 }
 0x369   : > { %3376 = vmatmul.mubr.bf16.gmra.mrb[28].mxu1 %v3637_v27 }
 0x36a   : > { %3424 = vmatmul.mubr.bf16.gmra.mrb[28].mxu0 %v2115_v23 }
 0x404   : > { %v3349_v48 = vpop.f32.mrb[0].mxu1 }
 0x405   : > { %v3397_v14 = vpop.f32.mrb[0].mxu0  ;;  %v2358_v33 = vpop.f32.mrb[1].mxu1 }
 0x406   : > { %v2576_v38 = vadd.f32 %v3397_v14, %v3349_v48  ;;  %v2567_v39 = vpop.f32.mrb[1].mxu0  ;;  %v3350_v43 = vpop.f32.mrb[2].mxu1 }
 0x407   : > { %v2568_v10 = vadd.f32 %v2567_v39, %v2358_v33  ;;  %v3398_v40 = vpop.f32.mrb[2].mxu0  ;;  %v2361_v13 = vpop.f32.mrb[3].mxu1 }
 0x408   : > { %v2703_v16 = vadd.f32 %v4463_v1, %v2576_v38  ;;  %v2579_v22 = vadd.f32 %v3398_v40, %v3350_v43  ;;  %v2570_v23 = vpop.f32.mrb[3].mxu0 }
 0x409   : > { %v2701_v4 = vadd.f32 %v4463_v1, %v2568_v10  ;;  %v2571_v20 = vadd.f32 %v2570_v23, %v2361_v13 }
 0x40a   : > { %2735 = vst [vmem:[%s3792_s23 + $0x10] sm:$0xff] %v2703_v16  ;;  %v2704_v44 = vadd.f32 %v4463_v1, %v2579_v22 }
 0x40b   : > { %2733 = vst [vmem:[%s3792_s23] sm:$0xff] %v2701_v4  ;;  %v2702_v41 = vadd.f32 %v4463_v1, %v2571_v20 }
 0x40c   : > { %2736 = vst [vmem:[%s3792_s23 + $0x18] sm:$0xff] %v2704_v44  ;;  %v3353_v42 = vpop.f32.mrb[4].mxu1 }
 0x40d   : > { %2734 = vst [vmem:[%s3792_s23 + $0x8] sm:$0xff] %v2702_v41  ;;  %v3401_v45 = vpop.f32.mrb[4].mxu0  ;;  %v2374_v46 = vpop.f32.mrb[5].mxu1 }
 0x40e   : > { %v2592_v49 = vadd.f32 %v3401_v45, %v3353_v42  ;;  %v2583_v50 = vpop.f32.mrb[5].mxu0  ;;  %v3354_v55 = vpop.f32.mrb[6].mxu1 }
 0x40f   : > { %v2584_v21 = vadd.f32 %v2583_v50, %v2374_v46  ;;  %v3402_v60 = vpop.f32.mrb[6].mxu0  ;;  %v2377_v52 = vpop.f32.mrb[7].mxu1 }
 0x410   : > { %v2707_v53 = vadd.f32 %v4463_v1, %v2592_v49  ;;  %v2595_v26 = vadd.f32 %v3402_v60, %v3354_v55  ;;  %v2586_v28 = vpop.f32.mrb[7].mxu0 }
 0x411   : > { %v2705_v47 = vadd.f32 %v4463_v1, %v2584_v21  ;;  %v2587_v24 = vadd.f32 %v2586_v28, %v2377_v52 }
 0x412   : > { %2739 = vst [vmem:[%s3792_s23 + $0x30] sm:$0xff] %v2707_v53  ;;  %v2708_v18 = vadd.f32 %v4463_v1, %v2595_v26 }
 0x413   : > { %2737 = vst [vmem:[%s3792_s23 + $0x20] sm:$0xff] %v2705_v47  ;;  %v2706_v56 = vadd.f32 %v4463_v1, %v2587_v24 }
 0x414   : > { %2740 = vst [vmem:[%s3792_s23 + $0x38] sm:$0xff] %v2708_v18  ;;  %v3357_v59 = vpop.f32.mrb[8].mxu1 }
 0x415   : > { %2738 = vst [vmem:[%s3792_s23 + $0x28] sm:$0xff] %v2706_v56  ;;  %v3405_v11 = vpop.f32.mrb[8].mxu0  ;;  %v2390_v29 = vpop.f32.mrb[9].mxu1 }
 0x416   : > { %v2608_v57 = vadd.f32 %v3405_v11, %v3357_v59  ;;  %v2599_v51 = vpop.f32.mrb[9].mxu0  ;;  %v3358_v58 = vpop.f32.mrb[10].mxu1 }
 0x417   : > { %v2600_v36 = vadd.f32 %v2599_v51, %v2390_v29  ;;  %v3406_v0 = vpop.f32.mrb[10].mxu0  ;;  %v2393_v12 = vpop.f32.mrb[11].mxu1 }
 0x418   : > { %v2711_v62 = vadd.f32 %v4463_v1, %v2608_v57  ;;  %v2611_v30 = vadd.f32 %v3406_v0, %v3358_v58  ;;  %v2602_v54 = vpop.f32.mrb[11].mxu0 }
 0x419   : > { %v2709_v63 = vadd.f32 %v4463_v1, %v2600_v36  ;;  %v2603_v2 = vadd.f32 %v2602_v54, %v2393_v12 }
 0x41a   : > { %2743 = vst [vmem:[%s3792_s23 + $0x50] sm:$0xff] %v2711_v62  ;;  %v2712_v3 = vadd.f32 %v4463_v1, %v2611_v30 }
 0x41b   : > { %2741 = vst [vmem:[%s3792_s23 + $0x40] sm:$0xff] %v2709_v63  ;;  %v2710_v6 = vadd.f32 %v4463_v1, %v2603_v2 }
 0x41c   : > { %2744 = vst [vmem:[%s3792_s23 + $0x58] sm:$0xff] %v2712_v3  ;;  %v3361_v8 = vpop.f32.mrb[12].mxu1 }
 0x41d   : > { %2742 = vst [vmem:[%s3792_s23 + $0x48] sm:$0xff] %v2710_v6  ;;  %v3409_v9 = vpop.f32.mrb[12].mxu0  ;;  %v2406_v37 = vpop.f32.mrb[13].mxu1 }
 0x41e   : > { %v2624_v15 = vadd.f32 %v3409_v9, %v3361_v8  ;;  %v2615_v61 = vpop.f32.mrb[13].mxu0  ;;  %v3362_v34 = vpop.f32.mrb[14].mxu1 }
 0x41f   : > { %v2616_v31 = vadd.f32 %v2615_v61, %v2406_v37  ;;  %v3410_v7 = vpop.f32.mrb[14].mxu0  ;;  %v2409_v32 = vpop.f32.mrb[15].mxu1 }
 0x420   : > { %v2715_v17 = vadd.f32 %v4463_v1, %v2624_v15  ;;  %v2627_v35 = vadd.f32 %v3410_v7, %v3362_v34  ;;  %v2618_v19 = vpop.f32.mrb[15].mxu0 }
 0x421   : > { %v2713_v5 = vadd.f32 %v4463_v1, %v2616_v31  ;;  %v2619_v25 = vadd.f32 %v2618_v19, %v2409_v32 }
 0x422   : > { %2747 = vst [vmem:[%s3792_s23 + $0x70] sm:$0xff] %v2715_v17  ;;  %v2716_v27 = vadd.f32 %v4463_v1, %v2627_v35 }
 0x423   : > { %2745 = vst [vmem:[%s3792_s23 + $0x60] sm:$0xff] %v2713_v5  ;;  %v2714_v48 = vadd.f32 %v4463_v1, %v2619_v25 }
 0x424   : > { %2748 = vst [vmem:[%s3792_s23 + $0x78] sm:$0xff] %v2716_v27  ;;  %v3365_v14 = vpop.f32.mrb[16].mxu1 }
 0x425   : > { %2746 = vst [vmem:[%s3792_s23 + $0x68] sm:$0xff] %v2714_v48  ;;  %v3413_v33 = vpop.f32.mrb[16].mxu0  ;;  %v2422_v38 = vpop.f32.mrb[17].mxu1 }
 0x426   : > { %v2640_v39 = vadd.f32 %v3413_v33, %v3365_v14  ;;  %v2631_v43 = vpop.f32.mrb[17].mxu0  ;;  %v3366_v10 = vpop.f32.mrb[18].mxu1 }
 0x427   : > { %v2632_v40 = vadd.f32 %v2631_v43, %v2422_v38  ;;  %v3414_v13 = vpop.f32.mrb[18].mxu0  ;;  %v2425_v16 = vpop.f32.mrb[19].mxu1 }
 0x428   : > { %v2719_v22 = vadd.f32 %v4463_v1, %v2640_v39  ;;  %v2643_v23 = vadd.f32 %v3414_v13, %v3366_v10  ;;  %v2634_v4 = vpop.f32.mrb[19].mxu0 }
 0x429   : > { %v2717_v20 = vadd.f32 %v4463_v1, %v2632_v40  ;;  %v2635_v44 = vadd.f32 %v2634_v4, %v2425_v16 }
 0x42a   : > { %2751 = vst [vmem:[%s3792_s23 + $0x90] sm:$0xff] %v2719_v22  ;;  %v2720_v41 = vadd.f32 %v4463_v1, %v2643_v23 }
 0x42b   : > { %2749 = vst [vmem:[%s3792_s23 + $0x80] sm:$0xff] %v2717_v20  ;;  %v2718_v42 = vadd.f32 %v4463_v1, %v2635_v44 }
 0x42c   : > { %2752 = vst [vmem:[%s3792_s23 + $0x98] sm:$0xff] %v2720_v41  ;;  %v3369_v45 = vpop.f32.mrb[20].mxu1 }
 0x42d   : > { %2750 = vst [vmem:[%s3792_s23 + $0x88] sm:$0xff] %v2718_v42  ;;  %v3417_v46 = vpop.f32.mrb[20].mxu0  ;;  %v2438_v49 = vpop.f32.mrb[21].mxu1 }
 0x42e   : > { %v2656_v50 = vadd.f32 %v3417_v46, %v3369_v45  ;;  %v2647_v55 = vpop.f32.mrb[21].mxu0  ;;  %v3370_v21 = vpop.f32.mrb[22].mxu1 }
 0x42f   : > { %v2648_v60 = vadd.f32 %v2647_v55, %v2438_v49  ;;  %v3418_v52 = vpop.f32.mrb[22].mxu0  ;;  %v2441_v53 = vpop.f32.mrb[23].mxu1 }
 0x430   : > { %v2723_v26 = vadd.f32 %v4463_v1, %v2656_v50  ;;  %v2659_v28 = vadd.f32 %v3418_v52, %v3370_v21  ;;  %v2650_v47 = vpop.f32.mrb[23].mxu0 }
 0x431   : > { %v2721_v24 = vadd.f32 %v4463_v1, %v2648_v60  ;;  %v2651_v18 = vadd.f32 %v2650_v47, %v2441_v53 }
 0x432   : > { %2755 = vst [vmem:[%s3792_s23 + $0xb0] sm:$0xff] %v2723_v26  ;;  %v2724_v56 = vadd.f32 %v4463_v1, %v2659_v28 }
 0x433   : > { %2753 = vst [vmem:[%s3792_s23 + $0xa0] sm:$0xff] %v2721_v24  ;;  %v2722_v59 = vadd.f32 %v4463_v1, %v2651_v18 }
 0x434   : > { %2756 = vst [vmem:[%s3792_s23 + $0xb8] sm:$0xff] %v2724_v56  ;;  %v3373_v11 = vpop.f32.mrb[24].mxu1 }
 0x435   : > { %2754 = vst [vmem:[%s3792_s23 + $0xa8] sm:$0xff] %v2722_v59  ;;  %v3421_v29 = vpop.f32.mrb[24].mxu0  ;;  %v2454_v57 = vpop.f32.mrb[25].mxu1 }
 0x436   : > { %v2672_v51 = vadd.f32 %v3421_v29, %v3373_v11  ;;  %v2663_v58 = vpop.f32.mrb[25].mxu0  ;;  %v3374_v36 = vpop.f32.mrb[26].mxu1 }
 0x437   : > { %v2664_v0 = vadd.f32 %v2663_v58, %v2454_v57  ;;  %v3422_v12 = vpop.f32.mrb[26].mxu0  ;;  %v2457_v62 = vpop.f32.mrb[27].mxu1 }
 0x438   : > { %v2727_v30 = vadd.f32 %v4463_v1, %v2672_v51  ;;  %v2675_v54 = vadd.f32 %v3422_v12, %v3374_v36  ;;  %v2666_v63 = vpop.f32.mrb[27].mxu0 }
 0x439   : > { %v2725_v2 = vadd.f32 %v4463_v1, %v2664_v0  ;;  %v2667_v3 = vadd.f32 %v2666_v63, %v2457_v62 }
 0x43a   : > { %2759 = vst [vmem:[%s3792_s23 + $0xd0] sm:$0xff] %v2727_v30  ;;  %v2728_v6 = vadd.f32 %v4463_v1, %v2675_v54 }
 0x43b   : > { %2757 = vst [vmem:[%s3792_s23 + $0xc0] sm:$0xff] %v2725_v2  ;;  %v2726_v8 = vadd.f32 %v4463_v1, %v2667_v3 }
 0x43c   : > { %2760 = vst [vmem:[%s3792_s23 + $0xd8] sm:$0xff] %v2728_v6  ;;  %v3377_v9 = vpop.f32.mrb[28].mxu1 }
 0x43d   : > { %2758 = vst [vmem:[%s3792_s23 + $0xc8] sm:$0xff] %v2726_v8  ;;  %v3425_v37 = vpop.f32.mrb[28].mxu0  ;;  %v2470_v15 = vpop.f32.mrb[29].mxu1 }
 0x43e   : > { %v2688_v61 = vadd.f32 %v3425_v37, %v3377_v9  ;;  %v2679_v34 = vpop.f32.mrb[29].mxu0  ;;  %v3378_v31 = vpop.f32.mrb[30].mxu1 }
 0x43f   : > { %v2680_v7 = vadd.f32 %v2679_v34, %v2470_v15  ;;  %v3426_v32 = vpop.f32.mrb[30].mxu0  ;;  %v2473_v17 = vpop.f32.mrb[31].mxu1 }
 0x440   : > { %v2731_v35 = vadd.f32 %v4463_v1, %v2688_v61  ;;  %v2691_v19 = vadd.f32 %v3426_v32, %v3378_v31  ;;  %v2682_v5 = vpop.f32.mrb[31].mxu0 }
 0x441   : > { %v2729_v25 = vadd.f32 %v4463_v1, %v2680_v7  ;;  %v2683_v27 = vadd.f32 %v2682_v5, %v2473_v17 }
 0x442   : > { %2763 = vst [vmem:[%s3792_s23 + $0xf0] sm:$0xff] %v2731_v35  ;;  %v2732_v48 = vadd.f32 %v4463_v1, %v2691_v19 }
 0x443   : > { %2761 = vst [vmem:[%s3792_s23 + $0xe0] sm:$0xff] %v2729_v25  ;;  %v2730_v14 = vadd.f32 %v4463_v1, %v2683_v27 }
 0x444   : > { %2764 = vst [vmem:[%s3792_s23 + $0xf8] sm:$0xff] %v2732_v48 }
 0x445   : > { %2762 = vst [vmem:[%s3792_s23 + $0xe8] sm:$0xff] %v2730_v14 }
 0x446 PF: > { %s20_s17 = sadd.s32 1, %s3676_s17   ;;  %s4559_s14 = sld [smem:[#allocation9_spill]] }
 0x447   : > { %p17_p0 = scmp.ge.s32.totalorder %s20_s17, 8   ;;  %s4560_s28 = sld [smem:[#allocation10_spill]] }
 0x448   : > { %s4561_s16 = sld [smem:[#allocation11_spill]]  ;;  %s4562_s13 = smov %s3668_s15 }
 0x449   :  { %19 = sbr.rel (!%p17_p0) target bundleno = 3 (0x3), region = 125 }
 0x44d   : > { %s4563_s15 = smov %s4560_s28 }

</bundles_post_ra>
